<compile_context>
chip_gen: v7x
topology: tpu7x:2x2x1
jax: 0.10.0
libtpu: 0.0.40
codegen_flags: <defaults>
</compile_context>

<pallas_src>
import math

import jax
import jax.numpy as jnp
from jax.experimental import pallas as pl
from jax.experimental.pallas import tpu as pltpu

N_PARAMS = 32          # packed scalar parameter vector length (padded)
UNDIST_ITERS = 5       # fixed-point undistortion iterations (OpenCV default-ish)


def _kernel_recip(x):
    """EUP approximate reciprocal + one Newton step (~f32 accuracy)."""
    r = pl.reciprocal(x, approx=True)
    return r * (2.0 - x * r)


def _undistort(u, v, inv_fx, inv_fy, cx, cy, k1, k2, p1, p2, k3, recip):
    """Pixel -> normalized coords with iterative radial/tangential undistortion."""
    x = (u - cx) * inv_fx
    y = (v - cy) * inv_fy
    x0, y0 = x, y
    for _ in range(UNDIST_ITERS):
        xx = x * x
        yy = y * y
        xy = x * y
        r2 = xx + yy
        rad = 1.0 + r2 * (k1 + r2 * (k2 + r2 * k3))
        dx = 2.0 * p1 * xy + p2 * (r2 + 2.0 * xx)
        dy = p1 * (r2 + 2.0 * yy) + 2.0 * p2 * xy
        inv_rad = recip(rad)
        x = (x0 - dx) * inv_rad
        y = (y0 - dy) * inv_rad
    return x, y


def _triangulate_kernel(params_ref, uc_ref, vc_ref, up_ref, vp_ref,
                        px_ref, py_ref, pz_ref, err_ref):
    # --- unpack scalar parameters from SMEM ---
    ifx_c = params_ref[0]; ify_c = params_ref[1]; cx_c = params_ref[2]; cy_c = params_ref[3]
    k1_c = params_ref[4]; k2_c = params_ref[5]; p1_c = params_ref[6]; p2_c = params_ref[7]; k3_c = params_ref[8]
    ifx_p = params_ref[9]; ify_p = params_ref[10]; cx_p = params_ref[11]; cy_p = params_ref[12]
    k1_p = params_ref[13]; k2_p = params_ref[14]; p1_p = params_ref[15]; p2_p = params_ref[16]; k3_p = params_ref[17]
    rt00 = params_ref[18]; rt01 = params_ref[19]; rt02 = params_ref[20]
    rt10 = params_ref[21]; rt11 = params_ref[22]; rt12 = params_ref[23]
    rt20 = params_ref[24]; rt21 = params_ref[25]; rt22 = params_ref[26]
    o2x = params_ref[27]; o2y = params_ref[28]; o2z = params_ref[29]

    # --- sublane+lane dense (TR, 128) coordinate tiles ---
    uc = uc_ref[...]
    vc = vc_ref[...]
    up = up_ref[...]
    vp = vp_ref[...]

    x1, y1 = _undistort(uc, vc, ifx_c, ify_c, cx_c, cy_c,
                        k1_c, k2_c, p1_c, p2_c, k3_c, _kernel_recip)
    x2, y2 = _undistort(up, vp, ifx_p, ify_p, cx_p, cy_p,
                        k1_p, k2_p, p1_p, p2_p, k3_p, _kernel_recip)

    # camera ray: origin o1 = 0, direction d1 = [x1, y1, 1]  (d1z folded as 1.0)
    # projector ray rotated into camera frame: d2 = R^T @ [x2, y2, 1]
    d2x = rt00 * x2 + rt01 * y2 + rt02
    d2y = rt10 * x2 + rt11 * y2 + rt12
    d2z = rt20 * x2 + rt21 * y2 + rt22

    # closest points between rays o1 + s*d1 and o2 + t*d2  (w = o1 - o2 = -o2)
    wx, wy, wz = -o2x, -o2y, -o2z
    a = x1 * x1 + y1 * y1 + 1.0
    b = x1 * d2x + y1 * d2y + d2z
    c = d2x * d2x + d2y * d2y + d2z * d2z
    d = x1 * wx + y1 * wy + wz
    e = d2x * wx + d2y * wy + d2z * wz
    # TODO(synk): no epsilon guard on denom (matches reference); near-parallel
    # rays would produce inf/NaN here just as in the PyTorch original.
    denom = a * c - b * b
    inv_denom = _kernel_recip(denom)
    s = (b * e - c * d) * inv_denom
    t = (a * e - b * d) * inv_denom

    p1x, p1y, p1z = s * x1, s * y1, s
    p2x = o2x + t * d2x
    p2y = o2y + t * d2y
    p2z = o2z + t * d2z

    px_ref[...] = 0.5 * (p1x + p2x)
    py_ref[...] = 0.5 * (p1y + p2y)
    pz_ref[...] = 0.5 * (p1z + p2z)

    gx, gy, gz = p1x - p2x, p1y - p2y, p1z - p2z
    err_ref[...] = jnp.sqrt(gx * gx + gy * gy + gz * gz)


def _pack_params(R, T, camera_mtx, camera_dist, projector_mtx, projector_dist):
    Rt = R.T
    o2 = -(Rt @ T.reshape(3))  # projector center in the camera frame
    cd = camera_dist.reshape(-1)[:5]
    pd = projector_dist.reshape(-1)[:5]
    params = jnp.concatenate([
        jnp.stack([1.0 / camera_mtx[0, 0], 1.0 / camera_mtx[1, 1],
                   camera_mtx[0, 2], camera_mtx[1, 2]]),
        cd,
        jnp.stack([1.0 / projector_mtx[0, 0], 1.0 / projector_mtx[1, 1],
                   projector_mtx[0, 2], projector_mtx[1, 2]]),
        pd,
        Rt.reshape(-1),
        o2.reshape(-1),
    ]).astype(jnp.float32)
    return jnp.pad(params, (0, N_PARAMS - params.shape[0]))


def _pick_tile_rows(rows, max_tile_rows):
    """Largest divisor of `rows` that is a multiple of 8 and <= max_tile_rows."""
    if rows % 8 != 0 or rows <= max_tile_rows:
        # small inputs: single full-extent block (valid: equals array dim)
        if rows % 8 != 0:
            return rows
        return rows
    tr = max_tile_rows - (max_tile_rows % 8)
    while rows % tr != 0:
        tr -= 8
    return tr


def plane_refine_forward(camera_points, projector_points, R, T, camera_mtx,
                         camera_dist, projector_mtx, projector_dist,
                         *, max_tile_rows=256):
    """Equivalent of PlaneRefine.forward -> (pts (N,3), pts_error (N,))."""
    N = camera_points.shape[0]
    assert N % 128 == 0, "N must be a multiple of 128 (lane width)"
    rows = N // 128
    tr = _pick_tile_rows(rows, max_tile_rows)
    grid = (rows // tr,)

    params = _pack_params(R, T, camera_mtx, camera_dist, projector_mtx, projector_dist)

    cam = camera_points.astype(jnp.float32)
    prj = projector_points.astype(jnp.float32)
    # per-coordinate sublane-dense layout: (rows, 128)
    uc = cam[:, 0].reshape(rows, 128)
    vc = cam[:, 1].reshape(rows, 128)
    up = prj[:, 0].reshape(rows, 128)
    vp = prj[:, 1].reshape(rows, 128)

    coord_spec = pl.BlockSpec((tr, 128), lambda i: (i, 0))

    px, py, pz, err = pl.pallas_call(
        _triangulate_kernel,
        out_shape=tuple(jax.ShapeDtypeStruct((rows, 128), jnp.float32)
                        for _ in range(4)),
        grid=grid,
        in_specs=[
            pl.BlockSpec(memory_space=pltpu.MemorySpace.SMEM),   # packed scalars
            coord_spec, coord_spec, coord_spec, coord_spec,
        ],
        out_specs=(coord_spec, coord_spec, coord_spec, coord_spec),
        compiler_params=pltpu.CompilerParams(dimension_semantics=("parallel",)),
    )(params, uc, vc, up, vp)

    pts = jnp.stack([px.reshape(N), py.reshape(N), pz.reshape(N)], axis=-1)
    return pts, err.reshape(N)


# ---------------- pure-JAX reference (same math) for validation ----------------
def _reference(camera_points, projector_points, R, T, camera_mtx, camera_dist,
               projector_mtx, projector_dist):
    def undist(p, K, dist):
        fx, fy, cx, cy = K[0, 0], K[1, 1], K[0, 2], K[1, 2]
        k1, k2, p1, p2, k3 = dist[:5]
        x, y = _undistort(p[:, 0], p[:, 1], 1.0 / fx, 1.0 / fy, cx, cy,
                          k1, k2, p1, p2, k3, lambda v: 1.0 / v)
        return jnp.stack([x, y], -1)

    n1 = undist(camera_points, camera_mtx, camera_dist.reshape(-1))
    n2 = undist(projector_points, projector_mtx, projector_dist.reshape(-1))
    d1 = jnp.concatenate([n1, jnp.ones((n1.shape[0], 1))], -1)
    d2 = jnp.concatenate([n2, jnp.ones((n2.shape[0], 1))], -1) @ R  # (R^T @ d2^T)^T
    o2 = -(R.T @ T.reshape(3))
    w = -o2[None, :]
    a = jnp.sum(d1 * d1, -1); b = jnp.sum(d1 * d2, -1); c = jnp.sum(d2 * d2, -1)
    d = jnp.sum(d1 * w, -1); e = jnp.sum(d2 * w, -1)
    denom = a * c - b * b
    s = (b * e - c * d) / denom
    t = (a * e - b * d) / denom
    p1 = s[:, None] * d1
    p2 = o2[None, :] + t[:, None] * d2
    return 0.5 * (p1 + p2), jnp.linalg.norm(p1 - p2, axis=-1)


if __name__ == "__main__":
    key = jax.random.PRNGKey(0)
    k_cam, k_prj = jax.random.split(key)

    N = 512  # number of point correspondences (small test shape)

    # deterministic "parameters" (what PlaneRefine.__init__ would hold)
    theta = 0.1
    R = jnp.array([[math.cos(theta), 0.0, math.sin(theta)],
                   [0.0, 1.0, 0.0],
                   [-math.sin(theta), 0.0, math.cos(theta)]], jnp.float32)
    T = jnp.array([[0.2], [0.0], [0.05]], jnp.float32)
    camera_mtx = jnp.array([[600.0, 0.0, 320.0],
                            [0.0, 600.0, 240.0],
                            [0.0, 0.0, 1.0]], jnp.float32)
    camera_dist = jnp.array([0.05, -0.02, 0.001, 0.001, 0.0005], jnp.float32)
    projector_mtx = jnp.array([[900.0, 0.0, 400.0],
                               [0.0, 900.0, 300.0],
                               [0.0, 0.0, 1.0]], jnp.float32)
    projector_dist = jnp.array([0.02, -0.01, 0.0005, 0.0005, 0.0002], jnp.float32)

    # deterministic example correspondences (pixel coordinates)
    camera_points = jax.random.uniform(k_cam, (N, 2), jnp.float32,
                                       minval=100.0, maxval=500.0)
    projector_points = jax.random.uniform(k_prj, (N, 2), jnp.float32,
                                          minval=100.0, maxval=600.0)

    pts, pts_error = plane_refine_forward(
        camera_points, projector_points, R, T,
        camera_mtx, camera_dist, projector_mtx, projector_dist)
    jax.block_until_ready((pts, pts_error))

    ref_pts, ref_err = _reference(camera_points, projector_points, R, T,
                                  camera_mtx, camera_dist, projector_mtx, projector_dist)
    assert pts.shape == (N, 3) and pts_error.shape == (N,)
    assert bool(jnp.all(jnp.isfinite(pts))) and bool(jnp.all(jnp.isfinite(pts_error)))
    assert jnp.allclose(pts, ref_pts, rtol=1e-3, atol=1e-3)
    assert jnp.allclose(pts_error, ref_err, rtol=1e-3, atol=1e-3)

    print("KERNEL_OK")
</pallas_src>

<mosaic_0001>
module attributes {stable_mosaic.version = 11 : i64} {
  func.func @_triangulate_kernel(%arg0: i32, %arg1: memref<32xf32, #tpu.memory_space<smem>>, %arg2: memref<4x128xf32, #tpu.memory_space<vmem>>, %arg3: memref<4x128xf32, #tpu.memory_space<vmem>>, %arg4: memref<4x128xf32, #tpu.memory_space<vmem>>, %arg5: memref<4x128xf32, #tpu.memory_space<vmem>>, %arg6: memref<4x128xf32, #tpu.memory_space<vmem>>, %arg7: memref<4x128xf32, #tpu.memory_space<vmem>>, %arg8: memref<4x128xf32, #tpu.memory_space<vmem>>, %arg9: memref<4x128xf32, #tpu.memory_space<vmem>>) attributes {dimension_semantics = [#tpu.dimension_semantics<parallel>], iteration_bounds = array<i64: 1>, scalar_prefetch = 0 : i64, scratch_operands = 0 : i64, tpu.core_type = #tpu.core_type<tc>, window_params = [{transform_indices = @transform_0, window_bounds = array<i64: 32>}, {transform_indices = @transform_1, window_bounds = array<i64: 4, 128>}, {transform_indices = @transform_2, window_bounds = array<i64: 4, 128>}, {transform_indices = @transform_3, window_bounds = array<i64: 4, 128>}, {transform_indices = @transform_4, window_bounds = array<i64: 4, 128>}, {transform_indices = @transform_5, window_bounds = array<i64: 4, 128>}, {transform_indices = @transform_6, window_bounds = array<i64: 4, 128>}, {transform_indices = @transform_7, window_bounds = array<i64: 4, 128>}, {transform_indices = @transform_8, window_bounds = array<i64: 4, 128>}]} {
    %c0 = arith.constant 0 : index
    %0 = memref.load %arg1[%c0] : memref<32xf32, #tpu.memory_space<smem>>
    %c1 = arith.constant 1 : index
    %1 = memref.load %arg1[%c1] : memref<32xf32, #tpu.memory_space<smem>>
    %c2 = arith.constant 2 : index
    %2 = memref.load %arg1[%c2] : memref<32xf32, #tpu.memory_space<smem>>
    %c3 = arith.constant 3 : index
    %3 = memref.load %arg1[%c3] : memref<32xf32, #tpu.memory_space<smem>>
    %c4 = arith.constant 4 : index
    %4 = memref.load %arg1[%c4] : memref<32xf32, #tpu.memory_space<smem>>
    %c5 = arith.constant 5 : index
    %5 = memref.load %arg1[%c5] : memref<32xf32, #tpu.memory_space<smem>>
    %c6 = arith.constant 6 : index
    %6 = memref.load %arg1[%c6] : memref<32xf32, #tpu.memory_space<smem>>
    %c7 = arith.constant 7 : index
    %7 = memref.load %arg1[%c7] : memref<32xf32, #tpu.memory_space<smem>>
    %c8 = arith.constant 8 : index
    %8 = memref.load %arg1[%c8] : memref<32xf32, #tpu.memory_space<smem>>
    %c9 = arith.constant 9 : index
    %9 = memref.load %arg1[%c9] : memref<32xf32, #tpu.memory_space<smem>>
    %c10 = arith.constant 10 : index
    %10 = memref.load %arg1[%c10] : memref<32xf32, #tpu.memory_space<smem>>
    %c11 = arith.constant 11 : index
    %11 = memref.load %arg1[%c11] : memref<32xf32, #tpu.memory_space<smem>>
    %c12 = arith.constant 12 : index
    %12 = memref.load %arg1[%c12] : memref<32xf32, #tpu.memory_space<smem>>
    %c13 = arith.constant 13 : index
    %13 = memref.load %arg1[%c13] : memref<32xf32, #tpu.memory_space<smem>>
    %c14 = arith.constant 14 : index
    %14 = memref.load %arg1[%c14] : memref<32xf32, #tpu.memory_space<smem>>
    %c15 = arith.constant 15 : index
    %15 = memref.load %arg1[%c15] : memref<32xf32, #tpu.memory_space<smem>>
    %c16 = arith.constant 16 : index
    %16 = memref.load %arg1[%c16] : memref<32xf32, #tpu.memory_space<smem>>
    %c17 = arith.constant 17 : index
    %17 = memref.load %arg1[%c17] : memref<32xf32, #tpu.memory_space<smem>>
    %c18 = arith.constant 18 : index
    %18 = memref.load %arg1[%c18] : memref<32xf32, #tpu.memory_space<smem>>
    %c19 = arith.constant 19 : index
    %19 = memref.load %arg1[%c19] : memref<32xf32, #tpu.memory_space<smem>>
    %c20 = arith.constant 20 : index
    %20 = memref.load %arg1[%c20] : memref<32xf32, #tpu.memory_space<smem>>
    %c21 = arith.constant 21 : index
    %21 = memref.load %arg1[%c21] : memref<32xf32, #tpu.memory_space<smem>>
    %c22 = arith.constant 22 : index
    %22 = memref.load %arg1[%c22] : memref<32xf32, #tpu.memory_space<smem>>
    %c23 = arith.constant 23 : index
    %23 = memref.load %arg1[%c23] : memref<32xf32, #tpu.memory_space<smem>>
    %c24 = arith.constant 24 : index
    %24 = memref.load %arg1[%c24] : memref<32xf32, #tpu.memory_space<smem>>
    %c25 = arith.constant 25 : index
    %25 = memref.load %arg1[%c25] : memref<32xf32, #tpu.memory_space<smem>>
    %c26 = arith.constant 26 : index
    %26 = memref.load %arg1[%c26] : memref<32xf32, #tpu.memory_space<smem>>
    %c27 = arith.constant 27 : index
    %27 = memref.load %arg1[%c27] : memref<32xf32, #tpu.memory_space<smem>>
    %c28 = arith.constant 28 : index
    %28 = memref.load %arg1[%c28] : memref<32xf32, #tpu.memory_space<smem>>
    %c29 = arith.constant 29 : index
    %29 = memref.load %arg1[%c29] : memref<32xf32, #tpu.memory_space<smem>>
    %c0_0 = arith.constant 0 : index
    %c0_1 = arith.constant 0 : index
    %30 = vector.load %arg2[%c0_0, %c0_1] : memref<4x128xf32, #tpu.memory_space<vmem>>, vector<4x128xf32>
    %c0_2 = arith.constant 0 : index
    %c0_3 = arith.constant 0 : index
    %31 = vector.load %arg3[%c0_2, %c0_3] : memref<4x128xf32, #tpu.memory_space<vmem>>, vector<4x128xf32>
    %c0_4 = arith.constant 0 : index
    %c0_5 = arith.constant 0 : index
    %32 = vector.load %arg4[%c0_4, %c0_5] : memref<4x128xf32, #tpu.memory_space<vmem>>, vector<4x128xf32>
    %c0_6 = arith.constant 0 : index
    %c0_7 = arith.constant 0 : index
    %33 = vector.load %arg5[%c0_6, %c0_7] : memref<4x128xf32, #tpu.memory_space<vmem>>, vector<4x128xf32>
    %34 = vector.broadcast %2 : f32 to vector<4x128xf32>
    %35 = arith.subf %30, %34 : vector<4x128xf32>
    %36 = vector.broadcast %0 : f32 to vector<4x128xf32>
    %37 = arith.mulf %35, %36 : vector<4x128xf32>
    %38 = vector.broadcast %3 : f32 to vector<4x128xf32>
    %39 = arith.subf %31, %38 : vector<4x128xf32>
    %40 = vector.broadcast %1 : f32 to vector<4x128xf32>
    %41 = arith.mulf %39, %40 : vector<4x128xf32>
    %42 = arith.mulf %37, %37 : vector<4x128xf32>
    %43 = arith.mulf %41, %41 : vector<4x128xf32>
    %44 = arith.mulf %37, %41 : vector<4x128xf32>
    %45 = arith.addf %42, %43 : vector<4x128xf32>
    %46 = vector.broadcast %8 : f32 to vector<4x128xf32>
    %47 = arith.mulf %45, %46 : vector<4x128xf32>
    %48 = vector.broadcast %5 : f32 to vector<4x128xf32>
    %49 = arith.addf %48, %47 : vector<4x128xf32>
    %50 = arith.mulf %45, %49 : vector<4x128xf32>
    %51 = vector.broadcast %4 : f32 to vector<4x128xf32>
    %52 = arith.addf %51, %50 : vector<4x128xf32>
    %53 = arith.mulf %45, %52 : vector<4x128xf32>
    %cst = arith.constant 1.000000e+00 : f32
    %54 = vector.broadcast %cst : f32 to vector<4x128xf32>
    %55 = arith.addf %54, %53 : vector<4x128xf32>
    %cst_8 = arith.constant 2.000000e+00 : f32
    %56 = arith.mulf %cst_8, %6 : f32
    %57 = vector.broadcast %56 : f32 to vector<4x128xf32>
    %58 = arith.mulf %57, %44 : vector<4x128xf32>
    %cst_9 = arith.constant 2.000000e+00 : f32
    %59 = vector.broadcast %cst_9 : f32 to vector<4x128xf32>
    %60 = arith.mulf %59, %42 : vector<4x128xf32>
    %61 = arith.addf %45, %60 : vector<4x128xf32>
    %62 = vector.broadcast %7 : f32 to vector<4x128xf32>
    %63 = arith.mulf %62, %61 : vector<4x128xf32>
    %64 = arith.addf %58, %63 : vector<4x128xf32>
    %cst_10 = arith.constant 2.000000e+00 : f32
    %65 = vector.broadcast %cst_10 : f32 to vector<4x128xf32>
    %66 = arith.mulf %65, %43 : vector<4x128xf32>
    %67 = arith.addf %45, %66 : vector<4x128xf32>
    %68 = vector.broadcast %6 : f32 to vector<4x128xf32>
    %69 = arith.mulf %68, %67 : vector<4x128xf32>
    %cst_11 = arith.constant 2.000000e+00 : f32
    %70 = arith.mulf %cst_11, %7 : f32
    %71 = vector.broadcast %70 : f32 to vector<4x128xf32>
    %72 = arith.mulf %71, %44 : vector<4x128xf32>
    %73 = arith.addf %69, %72 : vector<4x128xf32>
    %74 = tpu.reciprocal %55 {approx = true} : vector<4x128xf32> -> vector<4x128xf32>
    %75 = arith.mulf %55, %74 : vector<4x128xf32>
    %cst_12 = arith.constant 2.000000e+00 : f32
    %76 = vector.broadcast %cst_12 : f32 to vector<4x128xf32>
    %77 = arith.subf %76, %75 : vector<4x128xf32>
    %78 = arith.mulf %74, %77 : vector<4x128xf32>
    %79 = arith.subf %37, %64 : vector<4x128xf32>
    %80 = arith.mulf %79, %78 : vector<4x128xf32>
    %81 = arith.subf %41, %73 : vector<4x128xf32>
    %82 = arith.mulf %81, %78 : vector<4x128xf32>
    %83 = arith.mulf %80, %80 : vector<4x128xf32>
    %84 = arith.mulf %82, %82 : vector<4x128xf32>
    %85 = arith.mulf %80, %82 : vector<4x128xf32>
    %86 = arith.addf %83, %84 : vector<4x128xf32>
    %87 = vector.broadcast %8 : f32 to vector<4x128xf32>
    %88 = arith.mulf %86, %87 : vector<4x128xf32>
    %89 = vector.broadcast %5 : f32 to vector<4x128xf32>
    %90 = arith.addf %89, %88 : vector<4x128xf32>
    %91 = arith.mulf %86, %90 : vector<4x128xf32>
    %92 = vector.broadcast %4 : f32 to vector<4x128xf32>
    %93 = arith.addf %92, %91 : vector<4x128xf32>
    %94 = arith.mulf %86, %93 : vector<4x128xf32>
    %cst_13 = arith.constant 1.000000e+00 : f32
    %95 = vector.broadcast %cst_13 : f32 to vector<4x128xf32>
    %96 = arith.addf %95, %94 : vector<4x128xf32>
    %cst_14 = arith.constant 2.000000e+00 : f32
    %97 = arith.mulf %cst_14, %6 : f32
    %98 = vector.broadcast %97 : f32 to vector<4x128xf32>
    %99 = arith.mulf %98, %85 : vector<4x128xf32>
    %cst_15 = arith.constant 2.000000e+00 : f32
    %100 = vector.broadcast %cst_15 : f32 to vector<4x128xf32>
    %101 = arith.mulf %100, %83 : vector<4x128xf32>
    %102 = arith.addf %86, %101 : vector<4x128xf32>
    %103 = vector.broadcast %7 : f32 to vector<4x128xf32>
    %104 = arith.mulf %103, %102 : vector<4x128xf32>
    %105 = arith.addf %99, %104 : vector<4x128xf32>
    %cst_16 = arith.constant 2.000000e+00 : f32
    %106 = vector.broadcast %cst_16 : f32 to vector<4x128xf32>
    %107 = arith.mulf %106, %84 : vector<4x128xf32>
    %108 = arith.addf %86, %107 : vector<4x128xf32>
    %109 = vector.broadcast %6 : f32 to vector<4x128xf32>
    %110 = arith.mulf %109, %108 : vector<4x128xf32>
    %cst_17 = arith.constant 2.000000e+00 : f32
    %111 = arith.mulf %cst_17, %7 : f32
    %112 = vector.broadcast %111 : f32 to vector<4x128xf32>
    %113 = arith.mulf %112, %85 : vector<4x128xf32>
    %114 = arith.addf %110, %113 : vector<4x128xf32>
    %115 = tpu.reciprocal %96 {approx = true} : vector<4x128xf32> -> vector<4x128xf32>
    %116 = arith.mulf %96, %115 : vector<4x128xf32>
    %cst_18 = arith.constant 2.000000e+00 : f32
    %117 = vector.broadcast %cst_18 : f32 to vector<4x128xf32>
    %118 = arith.subf %117, %116 : vector<4x128xf32>
    %119 = arith.mulf %115, %118 : vector<4x128xf32>
    %120 = arith.subf %37, %105 : vector<4x128xf32>
    %121 = arith.mulf %120, %119 : vector<4x128xf32>
    %122 = arith.subf %41, %114 : vector<4x128xf32>
    %123 = arith.mulf %122, %119 : vector<4x128xf32>
    %124 = arith.mulf %121, %121 : vector<4x128xf32>
    %125 = arith.mulf %123, %123 : vector<4x128xf32>
    %126 = arith.mulf %121, %123 : vector<4x128xf32>
    %127 = arith.addf %124, %125 : vector<4x128xf32>
    %128 = vector.broadcast %8 : f32 to vector<4x128xf32>
    %129 = arith.mulf %127, %128 : vector<4x128xf32>
    %130 = vector.broadcast %5 : f32 to vector<4x128xf32>
    %131 = arith.addf %130, %129 : vector<4x128xf32>
    %132 = arith.mulf %127, %131 : vector<4x128xf32>
    %133 = vector.broadcast %4 : f32 to vector<4x128xf32>
    %134 = arith.addf %133, %132 : vector<4x128xf32>
    %135 = arith.mulf %127, %134 : vector<4x128xf32>
    %cst_19 = arith.constant 1.000000e+00 : f32
    %136 = vector.broadcast %cst_19 : f32 to vector<4x128xf32>
    %137 = arith.addf %136, %135 : vector<4x128xf32>
    %cst_20 = arith.constant 2.000000e+00 : f32
    %138 = arith.mulf %cst_20, %6 : f32
    %139 = vector.broadcast %138 : f32 to vector<4x128xf32>
    %140 = arith.mulf %139, %126 : vector<4x128xf32>
    %cst_21 = arith.constant 2.000000e+00 : f32
    %141 = vector.broadcast %cst_21 : f32 to vector<4x128xf32>
    %142 = arith.mulf %141, %124 : vector<4x128xf32>
    %143 = arith.addf %127, %142 : vector<4x128xf32>
    %144 = vector.broadcast %7 : f32 to vector<4x128xf32>
    %145 = arith.mulf %144, %143 : vector<4x128xf32>
    %146 = arith.addf %140, %145 : vector<4x128xf32>
    %cst_22 = arith.constant 2.000000e+00 : f32
    %147 = vector.broadcast %cst_22 : f32 to vector<4x128xf32>
    %148 = arith.mulf %147, %125 : vector<4x128xf32>
    %149 = arith.addf %127, %148 : vector<4x128xf32>
    %150 = vector.broadcast %6 : f32 to vector<4x128xf32>
    %151 = arith.mulf %150, %149 : vector<4x128xf32>
    %cst_23 = arith.constant 2.000000e+00 : f32
    %152 = arith.mulf %cst_23, %7 : f32
    %153 = vector.broadcast %152 : f32 to vector<4x128xf32>
    %154 = arith.mulf %153, %126 : vector<4x128xf32>
    %155 = arith.addf %151, %154 : vector<4x128xf32>
    %156 = tpu.reciprocal %137 {approx = true} : vector<4x128xf32> -> vector<4x128xf32>
    %157 = arith.mulf %137, %156 : vector<4x128xf32>
    %cst_24 = arith.constant 2.000000e+00 : f32
    %158 = vector.broadcast %cst_24 : f32 to vector<4x128xf32>
    %159 = arith.subf %158, %157 : vector<4x128xf32>
    %160 = arith.mulf %156, %159 : vector<4x128xf32>
    %161 = arith.subf %37, %146 : vector<4x128xf32>
    %162 = arith.mulf %161, %160 : vector<4x128xf32>
    %163 = arith.subf %41, %155 : vector<4x128xf32>
    %164 = arith.mulf %163, %160 : vector<4x128xf32>
    %165 = arith.mulf %162, %162 : vector<4x128xf32>
    %166 = arith.mulf %164, %164 : vector<4x128xf32>
    %167 = arith.mulf %162, %164 : vector<4x128xf32>
    %168 = arith.addf %165, %166 : vector<4x128xf32>
    %169 = vector.broadcast %8 : f32 to vector<4x128xf32>
    %170 = arith.mulf %168, %169 : vector<4x128xf32>
    %171 = vector.broadcast %5 : f32 to vector<4x128xf32>
    %172 = arith.addf %171, %170 : vector<4x128xf32>
    %173 = arith.mulf %168, %172 : vector<4x128xf32>
    %174 = vector.broadcast %4 : f32 to vector<4x128xf32>
    %175 = arith.addf %174, %173 : vector<4x128xf32>
    %176 = arith.mulf %168, %175 : vector<4x128xf32>
    %cst_25 = arith.constant 1.000000e+00 : f32
    %177 = vector.broadcast %cst_25 : f32 to vector<4x128xf32>
    %178 = arith.addf %177, %176 : vector<4x128xf32>
    %cst_26 = arith.constant 2.000000e+00 : f32
    %179 = arith.mulf %cst_26, %6 : f32
    %180 = vector.broadcast %179 : f32 to vector<4x128xf32>
    %181 = arith.mulf %180, %167 : vector<4x128xf32>
    %cst_27 = arith.constant 2.000000e+00 : f32
    %182 = vector.broadcast %cst_27 : f32 to vector<4x128xf32>
    %183 = arith.mulf %182, %165 : vector<4x128xf32>
    %184 = arith.addf %168, %183 : vector<4x128xf32>
    %185 = vector.broadcast %7 : f32 to vector<4x128xf32>
    %186 = arith.mulf %185, %184 : vector<4x128xf32>
    %187 = arith.addf %181, %186 : vector<4x128xf32>
    %cst_28 = arith.constant 2.000000e+00 : f32
    %188 = vector.broadcast %cst_28 : f32 to vector<4x128xf32>
    %189 = arith.mulf %188, %166 : vector<4x128xf32>
    %190 = arith.addf %168, %189 : vector<4x128xf32>
    %191 = vector.broadcast %6 : f32 to vector<4x128xf32>
    %192 = arith.mulf %191, %190 : vector<4x128xf32>
    %cst_29 = arith.constant 2.000000e+00 : f32
    %193 = arith.mulf %cst_29, %7 : f32
    %194 = vector.broadcast %193 : f32 to vector<4x128xf32>
    %195 = arith.mulf %194, %167 : vector<4x128xf32>
    %196 = arith.addf %192, %195 : vector<4x128xf32>
    %197 = tpu.reciprocal %178 {approx = true} : vector<4x128xf32> -> vector<4x128xf32>
    %198 = arith.mulf %178, %197 : vector<4x128xf32>
    %cst_30 = arith.constant 2.000000e+00 : f32
    %199 = vector.broadcast %cst_30 : f32 to vector<4x128xf32>
    %200 = arith.subf %199, %198 : vector<4x128xf32>
    %201 = arith.mulf %197, %200 : vector<4x128xf32>
    %202 = arith.subf %37, %187 : vector<4x128xf32>
    %203 = arith.mulf %202, %201 : vector<4x128xf32>
    %204 = arith.subf %41, %196 : vector<4x128xf32>
    %205 = arith.mulf %204, %201 : vector<4x128xf32>
    %206 = arith.mulf %203, %203 : vector<4x128xf32>
    %207 = arith.mulf %205, %205 : vector<4x128xf32>
    %208 = arith.mulf %203, %205 : vector<4x128xf32>
    %209 = arith.addf %206, %207 : vector<4x128xf32>
    %210 = vector.broadcast %8 : f32 to vector<4x128xf32>
    %211 = arith.mulf %209, %210 : vector<4x128xf32>
    %212 = vector.broadcast %5 : f32 to vector<4x128xf32>
    %213 = arith.addf %212, %211 : vector<4x128xf32>
    %214 = arith.mulf %209, %213 : vector<4x128xf32>
    %215 = vector.broadcast %4 : f32 to vector<4x128xf32>
    %216 = arith.addf %215, %214 : vector<4x128xf32>
    %217 = arith.mulf %209, %216 : vector<4x128xf32>
    %cst_31 = arith.constant 1.000000e+00 : f32
    %218 = vector.broadcast %cst_31 : f32 to vector<4x128xf32>
    %219 = arith.addf %218, %217 : vector<4x128xf32>
    %cst_32 = arith.constant 2.000000e+00 : f32
    %220 = arith.mulf %cst_32, %6 : f32
    %221 = vector.broadcast %220 : f32 to vector<4x128xf32>
    %222 = arith.mulf %221, %208 : vector<4x128xf32>
    %cst_33 = arith.constant 2.000000e+00 : f32
    %223 = vector.broadcast %cst_33 : f32 to vector<4x128xf32>
    %224 = arith.mulf %223, %206 : vector<4x128xf32>
    %225 = arith.addf %209, %224 : vector<4x128xf32>
    %226 = vector.broadcast %7 : f32 to vector<4x128xf32>
    %227 = arith.mulf %226, %225 : vector<4x128xf32>
    %228 = arith.addf %222, %227 : vector<4x128xf32>
    %cst_34 = arith.constant 2.000000e+00 : f32
    %229 = vector.broadcast %cst_34 : f32 to vector<4x128xf32>
    %230 = arith.mulf %229, %207 : vector<4x128xf32>
    %231 = arith.addf %209, %230 : vector<4x128xf32>
    %232 = vector.broadcast %6 : f32 to vector<4x128xf32>
    %233 = arith.mulf %232, %231 : vector<4x128xf32>
    %cst_35 = arith.constant 2.000000e+00 : f32
    %234 = arith.mulf %cst_35, %7 : f32
    %235 = vector.broadcast %234 : f32 to vector<4x128xf32>
    %236 = arith.mulf %235, %208 : vector<4x128xf32>
    %237 = arith.addf %233, %236 : vector<4x128xf32>
    %238 = tpu.reciprocal %219 {approx = true} : vector<4x128xf32> -> vector<4x128xf32>
    %239 = arith.mulf %219, %238 : vector<4x128xf32>
    %cst_36 = arith.constant 2.000000e+00 : f32
    %240 = vector.broadcast %cst_36 : f32 to vector<4x128xf32>
    %241 = arith.subf %240, %239 : vector<4x128xf32>
    %242 = arith.mulf %238, %241 : vector<4x128xf32>
    %243 = arith.subf %37, %228 : vector<4x128xf32>
    %244 = arith.mulf %243, %242 : vector<4x128xf32>
    %245 = arith.subf %41, %237 : vector<4x128xf32>
    %246 = arith.mulf %245, %242 : vector<4x128xf32>
    %247 = vector.broadcast %11 : f32 to vector<4x128xf32>
    %248 = arith.subf %32, %247 : vector<4x128xf32>
    %249 = vector.broadcast %9 : f32 to vector<4x128xf32>
    %250 = arith.mulf %248, %249 : vector<4x128xf32>
    %251 = vector.broadcast %12 : f32 to vector<4x128xf32>
    %252 = arith.subf %33, %251 : vector<4x128xf32>
    %253 = vector.broadcast %10 : f32 to vector<4x128xf32>
    %254 = arith.mulf %252, %253 : vector<4x128xf32>
    %255 = arith.mulf %250, %250 : vector<4x128xf32>
    %256 = arith.mulf %254, %254 : vector<4x128xf32>
    %257 = arith.mulf %250, %254 : vector<4x128xf32>
    %258 = arith.addf %255, %256 : vector<4x128xf32>
    %259 = vector.broadcast %17 : f32 to vector<4x128xf32>
    %260 = arith.mulf %258, %259 : vector<4x128xf32>
    %261 = vector.broadcast %14 : f32 to vector<4x128xf32>
    %262 = arith.addf %261, %260 : vector<4x128xf32>
    %263 = arith.mulf %258, %262 : vector<4x128xf32>
    %264 = vector.broadcast %13 : f32 to vector<4x128xf32>
    %265 = arith.addf %264, %263 : vector<4x128xf32>
    %266 = arith.mulf %258, %265 : vector<4x128xf32>
    %cst_37 = arith.constant 1.000000e+00 : f32
    %267 = vector.broadcast %cst_37 : f32 to vector<4x128xf32>
    %268 = arith.addf %267, %266 : vector<4x128xf32>
    %cst_38 = arith.constant 2.000000e+00 : f32
    %269 = arith.mulf %cst_38, %15 : f32
    %270 = vector.broadcast %269 : f32 to vector<4x128xf32>
    %271 = arith.mulf %270, %257 : vector<4x128xf32>
    %cst_39 = arith.constant 2.000000e+00 : f32
    %272 = vector.broadcast %cst_39 : f32 to vector<4x128xf32>
    %273 = arith.mulf %272, %255 : vector<4x128xf32>
    %274 = arith.addf %258, %273 : vector<4x128xf32>
    %275 = vector.broadcast %16 : f32 to vector<4x128xf32>
    %276 = arith.mulf %275, %274 : vector<4x128xf32>
    %277 = arith.addf %271, %276 : vector<4x128xf32>
    %cst_40 = arith.constant 2.000000e+00 : f32
    %278 = vector.broadcast %cst_40 : f32 to vector<4x128xf32>
    %279 = arith.mulf %278, %256 : vector<4x128xf32>
    %280 = arith.addf %258, %279 : vector<4x128xf32>
    %281 = vector.broadcast %15 : f32 to vector<4x128xf32>
    %282 = arith.mulf %281, %280 : vector<4x128xf32>
    %cst_41 = arith.constant 2.000000e+00 : f32
    %283 = arith.mulf %cst_41, %16 : f32
    %284 = vector.broadcast %283 : f32 to vector<4x128xf32>
    %285 = arith.mulf %284, %257 : vector<4x128xf32>
    %286 = arith.addf %282, %285 : vector<4x128xf32>
    %287 = tpu.reciprocal %268 {approx = true} : vector<4x128xf32> -> vector<4x128xf32>
    %288 = arith.mulf %268, %287 : vector<4x128xf32>
    %cst_42 = arith.constant 2.000000e+00 : f32
    %289 = vector.broadcast %cst_42 : f32 to vector<4x128xf32>
    %290 = arith.subf %289, %288 : vector<4x128xf32>
    %291 = arith.mulf %287, %290 : vector<4x128xf32>
    %292 = arith.subf %250, %277 : vector<4x128xf32>
    %293 = arith.mulf %292, %291 : vector<4x128xf32>
    %294 = arith.subf %254, %286 : vector<4x128xf32>
    %295 = arith.mulf %294, %291 : vector<4x128xf32>
    %296 = arith.mulf %293, %293 : vector<4x128xf32>
    %297 = arith.mulf %295, %295 : vector<4x128xf32>
    %298 = arith.mulf %293, %295 : vector<4x128xf32>
    %299 = arith.addf %296, %297 : vector<4x128xf32>
    %300 = vector.broadcast %17 : f32 to vector<4x128xf32>
    %301 = arith.mulf %299, %300 : vector<4x128xf32>
    %302 = vector.broadcast %14 : f32 to vector<4x128xf32>
    %303 = arith.addf %302, %301 : vector<4x128xf32>
    %304 = arith.mulf %299, %303 : vector<4x128xf32>
    %305 = vector.broadcast %13 : f32 to vector<4x128xf32>
    %306 = arith.addf %305, %304 : vector<4x128xf32>
    %307 = arith.mulf %299, %306 : vector<4x128xf32>
    %cst_43 = arith.constant 1.000000e+00 : f32
    %308 = vector.broadcast %cst_43 : f32 to vector<4x128xf32>
    %309 = arith.addf %308, %307 : vector<4x128xf32>
    %cst_44 = arith.constant 2.000000e+00 : f32
    %310 = arith.mulf %cst_44, %15 : f32
    %311 = vector.broadcast %310 : f32 to vector<4x128xf32>
    %312 = arith.mulf %311, %298 : vector<4x128xf32>
    %cst_45 = arith.constant 2.000000e+00 : f32
    %313 = vector.broadcast %cst_45 : f32 to vector<4x128xf32>
    %314 = arith.mulf %313, %296 : vector<4x128xf32>
    %315 = arith.addf %299, %314 : vector<4x128xf32>
    %316 = vector.broadcast %16 : f32 to vector<4x128xf32>
    %317 = arith.mulf %316, %315 : vector<4x128xf32>
    %318 = arith.addf %312, %317 : vector<4x128xf32>
    %cst_46 = arith.constant 2.000000e+00 : f32
    %319 = vector.broadcast %cst_46 : f32 to vector<4x128xf32>
    %320 = arith.mulf %319, %297 : vector<4x128xf32>
    %321 = arith.addf %299, %320 : vector<4x128xf32>
    %322 = vector.broadcast %15 : f32 to vector<4x128xf32>
    %323 = arith.mulf %322, %321 : vector<4x128xf32>
    %cst_47 = arith.constant 2.000000e+00 : f32
    %324 = arith.mulf %cst_47, %16 : f32
    %325 = vector.broadcast %324 : f32 to vector<4x128xf32>
    %326 = arith.mulf %325, %298 : vector<4x128xf32>
    %327 = arith.addf %323, %326 : vector<4x128xf32>
    %328 = tpu.reciprocal %309 {approx = true} : vector<4x128xf32> -> vector<4x128xf32>
    %329 = arith.mulf %309, %328 : vector<4x128xf32>
    %cst_48 = arith.constant 2.000000e+00 : f32
    %330 = vector.broadcast %cst_48 : f32 to vector<4x128xf32>
    %331 = arith.subf %330, %329 : vector<4x128xf32>
    %332 = arith.mulf %328, %331 : vector<4x128xf32>
    %333 = arith.subf %250, %318 : vector<4x128xf32>
    %334 = arith.mulf %333, %332 : vector<4x128xf32>
    %335 = arith.subf %254, %327 : vector<4x128xf32>
    %336 = arith.mulf %335, %332 : vector<4x128xf32>
    %337 = arith.mulf %334, %334 : vector<4x128xf32>
    %338 = arith.mulf %336, %336 : vector<4x128xf32>
    %339 = arith.mulf %334, %336 : vector<4x128xf32>
    %340 = arith.addf %337, %338 : vector<4x128xf32>
    %341 = vector.broadcast %17 : f32 to vector<4x128xf32>
    %342 = arith.mulf %340, %341 : vector<4x128xf32>
    %343 = vector.broadcast %14 : f32 to vector<4x128xf32>
    %344 = arith.addf %343, %342 : vector<4x128xf32>
    %345 = arith.mulf %340, %344 : vector<4x128xf32>
    %346 = vector.broadcast %13 : f32 to vector<4x128xf32>
    %347 = arith.addf %346, %345 : vector<4x128xf32>
    %348 = arith.mulf %340, %347 : vector<4x128xf32>
    %cst_49 = arith.constant 1.000000e+00 : f32
    %349 = vector.broadcast %cst_49 : f32 to vector<4x128xf32>
    %350 = arith.addf %349, %348 : vector<4x128xf32>
    %cst_50 = arith.constant 2.000000e+00 : f32
    %351 = arith.mulf %cst_50, %15 : f32
    %352 = vector.broadcast %351 : f32 to vector<4x128xf32>
    %353 = arith.mulf %352, %339 : vector<4x128xf32>
    %cst_51 = arith.constant 2.000000e+00 : f32
    %354 = vector.broadcast %cst_51 : f32 to vector<4x128xf32>
    %355 = arith.mulf %354, %337 : vector<4x128xf32>
    %356 = arith.addf %340, %355 : vector<4x128xf32>
    %357 = vector.broadcast %16 : f32 to vector<4x128xf32>
    %358 = arith.mulf %357, %356 : vector<4x128xf32>
    %359 = arith.addf %353, %358 : vector<4x128xf32>
    %cst_52 = arith.constant 2.000000e+00 : f32
    %360 = vector.broadcast %cst_52 : f32 to vector<4x128xf32>
    %361 = arith.mulf %360, %338 : vector<4x128xf32>
    %362 = arith.addf %340, %361 : vector<4x128xf32>
    %363 = vector.broadcast %15 : f32 to vector<4x128xf32>
    %364 = arith.mulf %363, %362 : vector<4x128xf32>
    %cst_53 = arith.constant 2.000000e+00 : f32
    %365 = arith.mulf %cst_53, %16 : f32
    %366 = vector.broadcast %365 : f32 to vector<4x128xf32>
    %367 = arith.mulf %366, %339 : vector<4x128xf32>
    %368 = arith.addf %364, %367 : vector<4x128xf32>
    %369 = tpu.reciprocal %350 {approx = true} : vector<4x128xf32> -> vector<4x128xf32>
    %370 = arith.mulf %350, %369 : vector<4x128xf32>
    %cst_54 = arith.constant 2.000000e+00 : f32
    %371 = vector.broadcast %cst_54 : f32 to vector<4x128xf32>
    %372 = arith.subf %371, %370 : vector<4x128xf32>
    %373 = arith.mulf %369, %372 : vector<4x128xf32>
    %374 = arith.subf %250, %359 : vector<4x128xf32>
    %375 = arith.mulf %374, %373 : vector<4x128xf32>
    %376 = arith.subf %254, %368 : vector<4x128xf32>
    %377 = arith.mulf %376, %373 : vector<4x128xf32>
    %378 = arith.mulf %375, %375 : vector<4x128xf32>
    %379 = arith.mulf %377, %377 : vector<4x128xf32>
    %380 = arith.mulf %375, %377 : vector<4x128xf32>
    %381 = arith.addf %378, %379 : vector<4x128xf32>
    %382 = vector.broadcast %17 : f32 to vector<4x128xf32>
    %383 = arith.mulf %381, %382 : vector<4x128xf32>
    %384 = vector.broadcast %14 : f32 to vector<4x128xf32>
    %385 = arith.addf %384, %383 : vector<4x128xf32>
    %386 = arith.mulf %381, %385 : vector<4x128xf32>
    %387 = vector.broadcast %13 : f32 to vector<4x128xf32>
    %388 = arith.addf %387, %386 : vector<4x128xf32>
    %389 = arith.mulf %381, %388 : vector<4x128xf32>
    %cst_55 = arith.constant 1.000000e+00 : f32
    %390 = vector.broadcast %cst_55 : f32 to vector<4x128xf32>
    %391 = arith.addf %390, %389 : vector<4x128xf32>
    %cst_56 = arith.constant 2.000000e+00 : f32
    %392 = arith.mulf %cst_56, %15 : f32
    %393 = vector.broadcast %392 : f32 to vector<4x128xf32>
    %394 = arith.mulf %393, %380 : vector<4x128xf32>
    %cst_57 = arith.constant 2.000000e+00 : f32
    %395 = vector.broadcast %cst_57 : f32 to vector<4x128xf32>
    %396 = arith.mulf %395, %378 : vector<4x128xf32>
    %397 = arith.addf %381, %396 : vector<4x128xf32>
    %398 = vector.broadcast %16 : f32 to vector<4x128xf32>
    %399 = arith.mulf %398, %397 : vector<4x128xf32>
    %400 = arith.addf %394, %399 : vector<4x128xf32>
    %cst_58 = arith.constant 2.000000e+00 : f32
    %401 = vector.broadcast %cst_58 : f32 to vector<4x128xf32>
    %402 = arith.mulf %401, %379 : vector<4x128xf32>
    %403 = arith.addf %381, %402 : vector<4x128xf32>
    %404 = vector.broadcast %15 : f32 to vector<4x128xf32>
    %405 = arith.mulf %404, %403 : vector<4x128xf32>
    %cst_59 = arith.constant 2.000000e+00 : f32
    %406 = arith.mulf %cst_59, %16 : f32
    %407 = vector.broadcast %406 : f32 to vector<4x128xf32>
    %408 = arith.mulf %407, %380 : vector<4x128xf32>
    %409 = arith.addf %405, %408 : vector<4x128xf32>
    %410 = tpu.reciprocal %391 {approx = true} : vector<4x128xf32> -> vector<4x128xf32>
    %411 = arith.mulf %391, %410 : vector<4x128xf32>
    %cst_60 = arith.constant 2.000000e+00 : f32
    %412 = vector.broadcast %cst_60 : f32 to vector<4x128xf32>
    %413 = arith.subf %412, %411 : vector<4x128xf32>
    %414 = arith.mulf %410, %413 : vector<4x128xf32>
    %415 = arith.subf %250, %400 : vector<4x128xf32>
    %416 = arith.mulf %415, %414 : vector<4x128xf32>
    %417 = arith.subf %254, %409 : vector<4x128xf32>
    %418 = arith.mulf %417, %414 : vector<4x128xf32>
    %419 = arith.mulf %416, %416 : vector<4x128xf32>
    %420 = arith.mulf %418, %418 : vector<4x128xf32>
    %421 = arith.mulf %416, %418 : vector<4x128xf32>
    %422 = arith.addf %419, %420 : vector<4x128xf32>
    %423 = vector.broadcast %17 : f32 to vector<4x128xf32>
    %424 = arith.mulf %422, %423 : vector<4x128xf32>
    %425 = vector.broadcast %14 : f32 to vector<4x128xf32>
    %426 = arith.addf %425, %424 : vector<4x128xf32>
    %427 = arith.mulf %422, %426 : vector<4x128xf32>
    %428 = vector.broadcast %13 : f32 to vector<4x128xf32>
    %429 = arith.addf %428, %427 : vector<4x128xf32>
    %430 = arith.mulf %422, %429 : vector<4x128xf32>
    %cst_61 = arith.constant 1.000000e+00 : f32
    %431 = vector.broadcast %cst_61 : f32 to vector<4x128xf32>
    %432 = arith.addf %431, %430 : vector<4x128xf32>
    %cst_62 = arith.constant 2.000000e+00 : f32
    %433 = arith.mulf %cst_62, %15 : f32
    %434 = vector.broadcast %433 : f32 to vector<4x128xf32>
    %435 = arith.mulf %434, %421 : vector<4x128xf32>
    %cst_63 = arith.constant 2.000000e+00 : f32
    %436 = vector.broadcast %cst_63 : f32 to vector<4x128xf32>
    %437 = arith.mulf %436, %419 : vector<4x128xf32>
    %438 = arith.addf %422, %437 : vector<4x128xf32>
    %439 = vector.broadcast %16 : f32 to vector<4x128xf32>
    %440 = arith.mulf %439, %438 : vector<4x128xf32>
    %441 = arith.addf %435, %440 : vector<4x128xf32>
    %cst_64 = arith.constant 2.000000e+00 : f32
    %442 = vector.broadcast %cst_64 : f32 to vector<4x128xf32>
    %443 = arith.mulf %442, %420 : vector<4x128xf32>
    %444 = arith.addf %422, %443 : vector<4x128xf32>
    %445 = vector.broadcast %15 : f32 to vector<4x128xf32>
    %446 = arith.mulf %445, %444 : vector<4x128xf32>
    %cst_65 = arith.constant 2.000000e+00 : f32
    %447 = arith.mulf %cst_65, %16 : f32
    %448 = vector.broadcast %447 : f32 to vector<4x128xf32>
    %449 = arith.mulf %448, %421 : vector<4x128xf32>
    %450 = arith.addf %446, %449 : vector<4x128xf32>
    %451 = tpu.reciprocal %432 {approx = true} : vector<4x128xf32> -> vector<4x128xf32>
    %452 = arith.mulf %432, %451 : vector<4x128xf32>
    %cst_66 = arith.constant 2.000000e+00 : f32
    %453 = vector.broadcast %cst_66 : f32 to vector<4x128xf32>
    %454 = arith.subf %453, %452 : vector<4x128xf32>
    %455 = arith.mulf %451, %454 : vector<4x128xf32>
    %456 = arith.subf %250, %441 : vector<4x128xf32>
    %457 = arith.mulf %456, %455 : vector<4x128xf32>
    %458 = arith.subf %254, %450 : vector<4x128xf32>
    %459 = arith.mulf %458, %455 : vector<4x128xf32>
    %460 = vector.broadcast %18 : f32 to vector<4x128xf32>
    %461 = arith.mulf %460, %457 : vector<4x128xf32>
    %462 = vector.broadcast %19 : f32 to vector<4x128xf32>
    %463 = arith.mulf %462, %459 : vector<4x128xf32>
    %464 = arith.addf %461, %463 : vector<4x128xf32>
    %465 = vector.broadcast %20 : f32 to vector<4x128xf32>
    %466 = arith.addf %464, %465 : vector<4x128xf32>
    %467 = vector.broadcast %21 : f32 to vector<4x128xf32>
    %468 = arith.mulf %467, %457 : vector<4x128xf32>
    %469 = vector.broadcast %22 : f32 to vector<4x128xf32>
    %470 = arith.mulf %469, %459 : vector<4x128xf32>
    %471 = arith.addf %468, %470 : vector<4x128xf32>
    %472 = vector.broadcast %23 : f32 to vector<4x128xf32>
    %473 = arith.addf %471, %472 : vector<4x128xf32>
    %474 = vector.broadcast %24 : f32 to vector<4x128xf32>
    %475 = arith.mulf %474, %457 : vector<4x128xf32>
    %476 = vector.broadcast %25 : f32 to vector<4x128xf32>
    %477 = arith.mulf %476, %459 : vector<4x128xf32>
    %478 = arith.addf %475, %477 : vector<4x128xf32>
    %479 = vector.broadcast %26 : f32 to vector<4x128xf32>
    %480 = arith.addf %478, %479 : vector<4x128xf32>
    %cst_67 = arith.constant 0.000000e+00 : f32
    %481 = arith.subf %cst_67, %27 : f32
    %cst_68 = arith.constant 0.000000e+00 : f32
    %482 = arith.subf %cst_68, %28 : f32
    %cst_69 = arith.constant 0.000000e+00 : f32
    %483 = arith.subf %cst_69, %29 : f32
    %484 = arith.mulf %244, %244 : vector<4x128xf32>
    %485 = arith.mulf %246, %246 : vector<4x128xf32>
    %486 = arith.addf %484, %485 : vector<4x128xf32>
    %cst_70 = arith.constant 1.000000e+00 : f32
    %487 = vector.broadcast %cst_70 : f32 to vector<4x128xf32>
    %488 = arith.addf %486, %487 : vector<4x128xf32>
    %489 = arith.mulf %244, %466 : vector<4x128xf32>
    %490 = arith.mulf %246, %473 : vector<4x128xf32>
    %491 = arith.addf %489, %490 : vector<4x128xf32>
    %492 = arith.addf %491, %480 : vector<4x128xf32>
    %493 = arith.mulf %466, %466 : vector<4x128xf32>
    %494 = arith.mulf %473, %473 : vector<4x128xf32>
    %495 = arith.addf %493, %494 : vector<4x128xf32>
    %496 = arith.mulf %480, %480 : vector<4x128xf32>
    %497 = arith.addf %495, %496 : vector<4x128xf32>
    %498 = vector.broadcast %481 : f32 to vector<4x128xf32>
    %499 = arith.mulf %244, %498 : vector<4x128xf32>
    %500 = vector.broadcast %482 : f32 to vector<4x128xf32>
    %501 = arith.mulf %246, %500 : vector<4x128xf32>
    %502 = arith.addf %499, %501 : vector<4x128xf32>
    %503 = vector.broadcast %483 : f32 to vector<4x128xf32>
    %504 = arith.addf %502, %503 : vector<4x128xf32>
    %505 = vector.broadcast %481 : f32 to vector<4x128xf32>
    %506 = arith.mulf %466, %505 : vector<4x128xf32>
    %507 = vector.broadcast %482 : f32 to vector<4x128xf32>
    %508 = arith.mulf %473, %507 : vector<4x128xf32>
    %509 = arith.addf %506, %508 : vector<4x128xf32>
    %510 = vector.broadcast %483 : f32 to vector<4x128xf32>
    %511 = arith.mulf %480, %510 : vector<4x128xf32>
    %512 = arith.addf %509, %511 : vector<4x128xf32>
    %513 = arith.mulf %488, %497 : vector<4x128xf32>
    %514 = arith.mulf %492, %492 : vector<4x128xf32>
    %515 = arith.subf %513, %514 : vector<4x128xf32>
    %516 = tpu.reciprocal %515 {approx = true} : vector<4x128xf32> -> vector<4x128xf32>
    %517 = arith.mulf %515, %516 : vector<4x128xf32>
    %cst_71 = arith.constant 2.000000e+00 : f32
    %518 = vector.broadcast %cst_71 : f32 to vector<4x128xf32>
    %519 = arith.subf %518, %517 : vector<4x128xf32>
    %520 = arith.mulf %516, %519 : vector<4x128xf32>
    %521 = arith.mulf %492, %512 : vector<4x128xf32>
    %522 = arith.mulf %497, %504 : vector<4x128xf32>
    %523 = arith.subf %521, %522 : vector<4x128xf32>
    %524 = arith.mulf %523, %520 : vector<4x128xf32>
    %525 = arith.mulf %488, %512 : vector<4x128xf32>
    %526 = arith.mulf %492, %504 : vector<4x128xf32>
    %527 = arith.subf %525, %526 : vector<4x128xf32>
    %528 = arith.mulf %527, %520 : vector<4x128xf32>
    %529 = arith.mulf %524, %244 : vector<4x128xf32>
    %530 = arith.mulf %524, %246 : vector<4x128xf32>
    %531 = arith.mulf %528, %466 : vector<4x128xf32>
    %532 = vector.broadcast %27 : f32 to vector<4x128xf32>
    %533 = arith.addf %532, %531 : vector<4x128xf32>
    %534 = arith.mulf %528, %473 : vector<4x128xf32>
    %535 = vector.broadcast %28 : f32 to vector<4x128xf32>
    %536 = arith.addf %535, %534 : vector<4x128xf32>
    %537 = arith.mulf %528, %480 : vector<4x128xf32>
    %538 = vector.broadcast %29 : f32 to vector<4x128xf32>
    %539 = arith.addf %538, %537 : vector<4x128xf32>
    %540 = arith.addf %529, %533 : vector<4x128xf32>
    %cst_72 = arith.constant 5.000000e-01 : f32
    %541 = vector.broadcast %cst_72 : f32 to vector<4x128xf32>
    %542 = arith.mulf %541, %540 : vector<4x128xf32>
    %c0_73 = arith.constant 0 : index
    %c0_74 = arith.constant 0 : index
    %543 = vector.load %arg6[%c0_73, %c0_74] : memref<4x128xf32, #tpu.memory_space<vmem>>, vector<4x128xf32>
    tpu.vector_store %arg6[%c0_73, %c0_74], %542 {strides = array<i32>} : memref<4x128xf32, #tpu.memory_space<vmem>>, vector<4x128xf32>,
    %544 = arith.addf %530, %536 : vector<4x128xf32>
    %cst_75 = arith.constant 5.000000e-01 : f32
    %545 = vector.broadcast %cst_75 : f32 to vector<4x128xf32>
    %546 = arith.mulf %545, %544 : vector<4x128xf32>
    %c0_76 = arith.constant 0 : index
    %c0_77 = arith.constant 0 : index
    %547 = vector.load %arg7[%c0_76, %c0_77] : memref<4x128xf32, #tpu.memory_space<vmem>>, vector<4x128xf32>
    tpu.vector_store %arg7[%c0_76, %c0_77], %546 {strides = array<i32>} : memref<4x128xf32, #tpu.memory_space<vmem>>, vector<4x128xf32>,
    %548 = arith.addf %524, %539 : vector<4x128xf32>
    %cst_78 = arith.constant 5.000000e-01 : f32
    %549 = vector.broadcast %cst_78 : f32 to vector<4x128xf32>
    %550 = arith.mulf %549, %548 : vector<4x128xf32>
    %c0_79 = arith.constant 0 : index
    %c0_80 = arith.constant 0 : index
    %551 = vector.load %arg8[%c0_79, %c0_80] : memref<4x128xf32, #tpu.memory_space<vmem>>, vector<4x128xf32>
    tpu.vector_store %arg8[%c0_79, %c0_80], %550 {strides = array<i32>} : memref<4x128xf32, #tpu.memory_space<vmem>>, vector<4x128xf32>,
    %552 = arith.subf %529, %533 : vector<4x128xf32>
    %553 = arith.subf %530, %536 : vector<4x128xf32>
    %554 = arith.subf %524, %539 : vector<4x128xf32>
    %555 = arith.mulf %552, %552 : vector<4x128xf32>
    %556 = arith.mulf %553, %553 : vector<4x128xf32>
    %557 = arith.addf %555, %556 : vector<4x128xf32>
    %558 = arith.mulf %554, %554 : vector<4x128xf32>
    %559 = arith.addf %557, %558 : vector<4x128xf32>
    %560 = math.sqrt %559 : vector<4x128xf32>
    %c0_81 = arith.constant 0 : index
    %c0_82 = arith.constant 0 : index
    %561 = vector.load %arg9[%c0_81, %c0_82] : memref<4x128xf32, #tpu.memory_space<vmem>>, vector<4x128xf32>
    tpu.vector_store %arg9[%c0_81, %c0_82], %560 {strides = array<i32>} : memref<4x128xf32, #tpu.memory_space<vmem>>, vector<4x128xf32>,
    return
  }
  func.func @transform_0(%arg0: i32) -> i32 {
    %c0_i32 = arith.constant 0 : i32
    %c0_i32_0 = arith.constant 0 : i32
    return %c0_i32 : i32
  }
  func.func @transform_1(%arg0: i32) -> (i32, i32) {
    %c0_i32 = arith.constant 0 : i32
    %c0_i32_0 = arith.constant 0 : i32
    return %arg0, %c0_i32 : i32, i32
  }
  func.func @transform_2(%arg0: i32) -> (i32, i32) {
    %c0_i32 = arith.constant 0 : i32
    %c0_i32_0 = arith.constant 0 : i32
    return %arg0, %c0_i32 : i32, i32
  }
  func.func @transform_3(%arg0: i32) -> (i32, i32) {
    %c0_i32 = arith.constant 0 : i32
    %c0_i32_0 = arith.constant 0 : i32
    return %arg0, %c0_i32 : i32, i32
  }
  func.func @transform_4(%arg0: i32) -> (i32, i32) {
    %c0_i32 = arith.constant 0 : i32
    %c0_i32_0 = arith.constant 0 : i32
    return %arg0, %c0_i32 : i32, i32
  }
  func.func @transform_5(%arg0: i32) -> (i32, i32) {
    %c0_i32 = arith.constant 0 : i32
    %c0_i32_0 = arith.constant 0 : i32
    return %arg0, %c0_i32 : i32, i32
  }
  func.func @transform_6(%arg0: i32) -> (i32, i32) {
    %c0_i32 = arith.constant 0 : i32
    %c0_i32_0 = arith.constant 0 : i32
    return %arg0, %c0_i32 : i32, i32
  }
  func.func @transform_7(%arg0: i32) -> (i32, i32) {
    %c0_i32 = arith.constant 0 : i32
    %c0_i32_0 = arith.constant 0 : i32
    return %arg0, %c0_i32 : i32, i32
  }
  func.func @transform_8(%arg0: i32) -> (i32, i32) {
    %c0_i32 = arith.constant 0 : i32
    %c0_i32_0 = arith.constant 0 : i32
    return %arg0, %c0_i32 : i32, i32
  }
}

</mosaic_0001>

<bundles_post_ra>
// kernel: tpu_custom_call.1
= control target key start
LH: loop header
LB: loop body
LE: loop exit
PB: predicated region body
PF: predicated region fallthrough
CT: control target
= control target key end

     0   :  { %14 = vsyncpa [#allocation5], 0  ;;  %s1097_s0 = inlined_call_operand.hbm [shape: f32[32], index: 0, kind: input, shape index: {}]   ;;  %s1098_s1 = inlined_call_operand.hbm [shape: f32[4,128], index: 1, kind: input, shape index: {}]   ;;  %s1099_s2 = inlined_call_operand.vmem [shape: f32[4,128], index: 2, kind: input, shape index: {}]   ;;  %s1100_s3 = inlined_call_operand.vmem [shape: f32[4,128], index: 3, kind: input, shape index: {}]   ;;  %s1101_s4 = inlined_call_operand.vmem [shape: f32[4,128], index: 4, kind: input, shape index: {}]   ;;  %s1102_s5 = inlined_call_operand.hbm [shape: f32[4,128], index: 5, kind: output, shape index: {0}]   ;;  %s1103_s6 = inlined_call_operand.hbm [shape: f32[4,128], index: 6, kind: output, shape index: {1}]   ;;  %s1104_s7 = inlined_call_operand.hbm [shape: f32[4,128], index: 7, kind: output, shape index: {2}]   ;;  %s1105_s8 = inlined_call_operand.hbm [shape: f32[4,128], index: 8, kind: output, shape index: {3}]  }
   0x1   :  { %15 = vsyncpa [#allocation3], 0 }
   0x2   :  { %16 = vsyncpa [#allocation4], 0 }
   0x3   :  { %17 = vsyncpa [#allocation9], 0 }
   0x4   :  { %18 = vsyncpa [#allocation12], 0  ;;  %s614_s29 = scalar_lea.hbm %s1097_s0, 16 }
   0x5   :  { %p615_p0 = scmp.ne.s32.totalorder %s1097_s0, %s614_s29  ;;  %p618_p1 = scmp.lt.u32.totalorder %s614_s29, %s1097_s0 }
   0x7   :  { %p620_p2 = pnand %p618_p1, %p615_p0 }
   0x9   :  { %623 = shalt.err (!%p620_p2)
}
   0xa   :  { %s744_s12 = smov [#allocation2]   ;;  %s745_s15 = smov [#allocation6]  }
   0xb   :  { %26 = dma.hbm_to_smem %s1097_s0, 16, %s744_s12, [#allocation5]  }
   0xc   :  { %s33_s16 = sshll.u32 %s745_s15, 4  ;;  %s624_s19 = scalar_lea.hbm %s1098_s1, 64  ;;  %s34_s16 = int_to_ptr.vmem [resolvable:$true] %s33_s16 }
   0xd   :  { %p625_p3 = scmp.ne.s32.totalorder %s1098_s1, %s624_s19  ;;  %p628_p4 = scmp.lt.u32.totalorder %s624_s19, %s1098_s1 }
   0xf   :  { %p630_p5 = pnand %p628_p4, %p625_p3 }
  0x11   :  { %633 = shalt.err (!%p630_p5)
}
  0x12   :  { %s634_s24 = scalar_lea.vmem %s34_s16, 64  ;;  %p639_p7 = scmp.lt.s32.totalorder %s34_s16, %s34_s16 }
  0x13   :  { %p635_p6 = scmp.ne.s32.totalorder %s34_s16, %s634_s24  ;;  %p640_p8 = scmp.lt.s32.totalorder %s634_s24, %s634_s24 }
  0x15   :  { %p641_p9 = por %p640_p8, %p639_p7 }
  0x17   :  { %p642_p10 = pnand %p641_p9, %p635_p6 }
  0x19   :  { %645 = shalt.err (!%p642_p10)
}
  0x1a   :  { %36 = dma.hbm_to_vmem [thread:$0]  %s1098_s1, 64, %s34_s16, [#allocation3]  }
  0x1b   :  { %734 = dma.done.wait [#allocation5], 16  }
  0x1c   :  { %735 = vsyncadd [#allocation5], 4294967280 }
  0x1d   :  { %736 = dma.done.wait [#allocation3], 64  }
  0x1e   :  { %737 = vsyncadd [#allocation3], 4294967232 }
  0x1f   :  { %49 = sfence }
  0x20   :  { %s50_s26 = sld [smem:[#allocation2]]  ;;  %s555_s27 = sld [smem:[#allocation2 + $0x1]]  ;;  %v80_v0 = vld [vmem:[#allocation6] sm:$0xf]  ;;  %v81_v1 = vld [vmem:[%s1099_s2] sm:$0xf] }
  0x21   :  { %s556_s28 = sld [smem:[#allocation2 + $0x2]]  ;;  %s557_s29 = sld [smem:[#allocation2 + $0x3]]  ;;  %v82_v8 = vld [vmem:[%s1100_s3] sm:$0xf] }
  0x22   :  { %s563_s30 = sld [smem:[#allocation2 + $0x9]]  ;;  %s562_s9 = sld [smem:[#allocation2 + $0x8]]  ;;  %v83_v13 = vld [vmem:[%s1101_s4] sm:$0xf] }
  0x23   :  { %s565_s10 = sld [smem:[#allocation2 + $0xb]]  ;;  %s564_s13 = sld [smem:[#allocation2 + $0xa]] }
  0x24   :  { %s566_s14 = sld [smem:[#allocation2 + $0xc]]  ;;  %s559_s1 = sld [smem:[#allocation2 + $0x5]] }
  0x25   :  { %s558_s17 = sld [smem:[#allocation2 + $0x4]]  ;;  %s571_s2 = sld [smem:[#allocation2 + $0x11]] }
  0x26   :  { %v86_v3 = vstv %s50_s26  ;;  %v90_v5 = vstv %s555_s27  ;;  %s568_s3 = sld [smem:[#allocation2 + $0xe]]  ;;  %s849_s20 = sld [smem:[#allocation2 + $0x7]] }
  0x27   :  { %v84_v2 = vstv %s556_s28  ;;  %v88_v4 = vstv %s557_s29  ;;  %s843_s4 = sld [smem:[#allocation2 + $0x6]]  ;;  %s567_s21 = sld [smem:[#allocation2 + $0xd]] }
  0x28   :  { %v85_v6 = vsub.f32 %v80_v0, %v84_v2  ;;  %v89_v7 = vsub.f32 %v81_v1, %v88_v4  ;;  %v243_v12 = vstv %s563_s30  ;;  %v836_v17 = vstv %s562_s9  ;;  %s862_s22 = sld [smem:[#allocation2 + $0xf]]  ;;  %s864_s23 = sld [smem:[#allocation2 + $0x10]] }
  0x29   :  { %v241_v11 = vstv %s565_s10  ;;  %v247_v21 = vstv %s564_s13  ;;  %s978_s27 = sld [smem:[#allocation2 + $0x12]]  ;;  %s980_s28 = sld [smem:[#allocation2 + $0x13]] }
  0x2a   :  { %v825_v9 = vmul.f32 %v86_v3, %v85_v6  ;;  %v827_v10 = vmul.f32 %v90_v5, %v89_v7  ;;  %v242_v16 = vsub.f32 %v82_v8, %v241_v11  ;;  %v245_v18 = vstv %s566_s14  ;;  %s982_s29 = sld [smem:[#allocation2 + $0x15]]  ;;  %s984_s30 = sld [smem:[#allocation2 + $0x16]] }
  0x2b   :  { %v840_v22 = vstv %s559_s1  ;;  %v246_v23 = vsub.f32 %v83_v13, %v245_v18  ;;  %v852_v28 = vstv %s558_s17  ;;  %v856_v31 = vstv %s571_s2  ;;  %s986_s9 = sld [smem:[#allocation2 + $0x18]]  ;;  %s988_s10 = sld [smem:[#allocation2 + $0x19]] }
  0x2c   :  { %v92_v14 = vmul.f32 %v825_v9, %v825_v9  ;;  %v93_v15 = vmul.f32 %v827_v10, %v827_v10  ;;  %v838_v20 = vmul.f32 %v243_v12, %v242_v16  ;;  %v859_v34 = vstv %s568_s3  ;;  %s117_s0 = smul.f32 2.0, %s849_s20  ;;  %s992_s11 = sld [smem:[#allocation2 + $0x14]] }
  0x2d   :  { %v845_v25 = vmul.f32 %v247_v21, %v246_v23  ;;  %s105_s24 = smul.f32 2.0, %s843_s4  ;;  %v869_v41 = vstv %s567_s21  ;;  %v94_v43 = vmul.f32 %v827_v10, %v825_v9  ;;  %v877_v48 = vstv %s849_s20  ;;  %s994_s12 = sld [smem:[#allocation2 + $0x17]] }
  0x2e   :  { %v95_v19 = vadd.f32 %v93_v15, %v92_v14  ;;  %v249_v26 = vmul.f32 %v838_v20, %v838_v20  ;;  %v108_v37 = vmul.f32 2.0, %v92_v14  ;;  %v113_v38 = vmul.f32 2.0, %v93_v15  ;;  %s262_s25 = smul.f32 2.0, %s862_s22  ;;  %s996_s13 = sld [smem:[#allocation2 + $0x1a]] }
  0x2f   :  { %v250_v29 = vmul.f32 %v845_v25, %v845_v25  ;;  %v873_v44 = vstv %s105_s24  ;;  %v880_v49 = vstv %s843_s4  ;;  %v882_v50 = vstv %s117_s0  ;;  %s274_s26 = smul.f32 2.0, %s864_s23  ;;  %s1004_s14 = sld [smem:[#allocation2 + $0x1b]] }
  0x30   :  { %v97_v24 = vmul.f32 %v836_v17, %v95_v19  ;;  %v109_v45 = vadd.f32 %v108_v37, %v95_v19  ;;  %v114_v46 = vadd.f32 %v113_v38, %v95_v19  ;;  %v107_v52 = vmul.f32 %v873_v44, %v94_v43  ;;  %s1010_s1 = sld [smem:[#allocation2 + $0x1c]]  ;;  %s1020_s15 = sld [smem:[#allocation2 + $0x1d]] }
  0x31   :  { %v252_v32 = vadd.f32 %v250_v29, %v249_v26  ;;  %v265_v53 = vmul.f32 2.0, %v249_v26  ;;  %v270_v54 = vmul.f32 2.0, %v250_v29  ;;  %v119_v57 = vmul.f32 %v882_v50, %v94_v43  ;;  %s746_s18 = smov [#allocation8]   ;;  %s747_s3 = smov [#allocation7]  }
  0x32   :  { %v99_v27 = vadd.f32 %v840_v22, %v97_v24  ;;  %v111_v55 = vmul.f32 %v877_v48, %v109_v45  ;;  %v116_v56 = vmul.f32 %v880_v49, %v114_v46  ;;  %v891_v59 = vstv %s862_s22  ;;  %s514_s19 = sshll.u32 %s746_s18, 4  ;;  %s504_s4 = sshll.u32 %s747_s3, 4  ;;  %s515_s19 = int_to_ptr.vmem [resolvable:$true] %s514_s19  ;;  %s1035_s4 = int_to_ptr.vmem [resolvable:$true] %s504_s4 }
  0x33   :  { %v254_v35 = vmul.f32 %v856_v31, %v252_v32  ;;  %v251_v60 = vmul.f32 %v845_v25, %v838_v20  ;;  %v266_v61 = vadd.f32 %v265_v53, %v252_v32  ;;  %v896_v62 = vstv %s864_s23  ;;  %s748_s20 = smov [#allocation10]   ;;  %s646_s22 = scalar_lea.vmem %s515_s19, 64 }
  0x34   :  { %v100_v30 = vmul.f32 %v99_v27, %v95_v19  ;;  %v271_v63 = vadd.f32 %v270_v54, %v252_v32  ;;  %v112_v0 = vadd.f32 %v111_v55, %v107_v52  ;;  %v120_v1 = vadd.f32 %v119_v57, %v116_v56  ;;  %s524_s21 = sshll.u32 %s748_s20, 4  ;;  %p647_p11 = scmp.ne.s32.totalorder %s515_s19, %s646_s22  ;;  %s1037_s21 = int_to_ptr.vmem [resolvable:$true] %s524_s21 }
  0x35   :  { %v256_v39 = vadd.f32 %v859_v34, %v254_v35  ;;  %v898_v2 = vstv %s262_s25  ;;  %v900_v3 = vstv %s274_s26  ;;  %v268_v7 = vmul.f32 %v896_v62, %v266_v61  ;;  %s419_s16 = ssub.f32 0.0, %s1004_s14  ;;  %p651_p12 = scmp.lt.s32.totalorder %s515_s19, %s515_s19 }
  0x36   :  { %v102_v33 = vadd.f32 %v852_v28, %v100_v30  ;;  %v264_v6 = vmul.f32 %v898_v2, %v251_v60  ;;  %v273_v8 = vmul.f32 %v891_v59, %v271_v63  ;;  %v276_v11 = vmul.f32 %v900_v3, %v251_v60  ;;  %s420_s17 = ssub.f32 0.0, %s1010_s1  ;;  %p652_p13 = scmp.lt.s32.totalorder %s646_s22, %s646_s22 }
  0x37   :  { %v257_v42 = vmul.f32 %v256_v39, %v252_v32  ;;  %v125_v13 = vsub.f32 %v825_v9, %v112_v0  ;;  %v127_v14 = vsub.f32 %v827_v10, %v120_v1  ;;  %s421_s2 = ssub.f32 0.0, %s1020_s15 }
  0x38   :  { %v103_v36 = vmul.f32 %v102_v33, %v95_v19  ;;  %v269_v16 = vadd.f32 %v268_v7, %v264_v6  ;;  %v277_v18 = vadd.f32 %v276_v11, %v273_v8  ;;  %p653_p0 = por %p652_p13, %p651_p12 }
  0x39   :  { %v259_v47 = vadd.f32 %v869_v41, %v257_v42 }
  0x3a   :  { %v104_v40 = vadd.f32 1.0, %v103_v36  ;;  %v282_v30 = vsub.f32 %v838_v20, %v269_v16  ;;  %p654_p1 = pnand %p653_p0, %p647_p11 }
  0x3b   :  { %v260_v51 = vmul.f32 %v259_v47, %v252_v32  ;;  %v284_v32 = vsub.f32 %v845_v25, %v277_v18 }
  0x3c   :  { %590 = vrcp.f32 %v104_v40 }
  0x3d   :  { %v261_v58 = vadd.f32 1.0, %v260_v51 }
  0x3f   :  { %592 = vrcp.f32 %v261_v58 }
  0x46   :  { %v591_v4 = vpop.eup %590 }
  0x47   :  { %v122_v5 = vmul.f32 %v591_v4, %v104_v40 }
  0x49   :  { %v123_v12 = vsub.f32 2.0, %v122_v5  ;;  %v593_v19 = vpop.eup %592 }
  0x4a   :  { %v279_v24 = vmul.f32 %v593_v19, %v261_v58 }
  0x4b   :  { %v124_v15 = vmul.f32 %v591_v4, %v123_v12 }
  0x4c   :  { %v280_v29 = vsub.f32 2.0, %v279_v24 }
  0x4d   :  { %v126_v21 = vmul.f32 %v125_v13, %v124_v15  ;;  %v128_v23 = vmul.f32 %v127_v14, %v124_v15 }
  0x4e   :  { %v281_v35 = vmul.f32 %v593_v19, %v280_v29 }
  0x4f   :  { %v129_v26 = vmul.f32 %v126_v21, %v126_v21  ;;  %v130_v27 = vmul.f32 %v128_v23, %v128_v23  ;;  %v131_v57 = vmul.f32 %v128_v23, %v126_v21 }
  0x50   :  { %v283_v37 = vmul.f32 %v282_v30, %v281_v35  ;;  %v285_v38 = vmul.f32 %v284_v32, %v281_v35 }
  0x51   :  { %v132_v33 = vadd.f32 %v130_v27, %v129_v26  ;;  %v140_v52 = vmul.f32 2.0, %v129_v26  ;;  %v144_v53 = vmul.f32 2.0, %v130_v27  ;;  %v139_v0 = vmul.f32 %v131_v57, %v873_v44 }
  0x52   :  { %v286_v40 = vmul.f32 %v283_v37, %v283_v37  ;;  %v287_v42 = vmul.f32 %v285_v38, %v285_v38  ;;  %v147_v7 = vmul.f32 %v131_v57, %v882_v50  ;;  %v288_v11 = vmul.f32 %v285_v38, %v283_v37 }
  0x53   :  { %v133_v36 = vmul.f32 %v132_v33, %v836_v17  ;;  %v141_v58 = vadd.f32 %v140_v52, %v132_v33  ;;  %v145_v60 = vadd.f32 %v144_v53, %v132_v33 }
  0x54   :  { %v289_v45 = vadd.f32 %v287_v42, %v286_v40  ;;  %v297_v1 = vmul.f32 2.0, %v286_v40  ;;  %v301_v4 = vmul.f32 2.0, %v287_v42  ;;  %v296_v19 = vmul.f32 %v288_v11, %v898_v2 }
  0x55   :  { %v134_v39 = vadd.f32 %v133_v36, %v840_v22  ;;  %v142_v5 = vmul.f32 %v141_v58, %v877_v48  ;;  %v146_v6 = vmul.f32 %v145_v60, %v880_v49  ;;  %v304_v24 = vmul.f32 %v288_v11, %v900_v3 }
  0x56   :  { %v290_v47 = vmul.f32 %v289_v45, %v856_v31  ;;  %v298_v12 = vadd.f32 %v297_v1, %v289_v45  ;;  %v302_v13 = vadd.f32 %v301_v4, %v289_v45 }
  0x57   :  { %v135_v43 = vmul.f32 %v134_v39, %v132_v33  ;;  %v143_v14 = vadd.f32 %v142_v5, %v139_v0  ;;  %v148_v15 = vadd.f32 %v147_v7, %v146_v6 }
  0x58   :  { %v291_v54 = vadd.f32 %v290_v47, %v859_v34  ;;  %v299_v21 = vmul.f32 %v298_v12, %v896_v62  ;;  %v303_v23 = vmul.f32 %v302_v13, %v891_v59 }
  0x59   :  { %v136_v46 = vadd.f32 %v135_v43, %v852_v28  ;;  %v153_v27 = vsub.f32 %v825_v9, %v143_v14  ;;  %v155_v29 = vsub.f32 %v827_v10, %v148_v15 }
  0x5a   :  { %v292_v56 = vmul.f32 %v291_v54, %v289_v45  ;;  %v300_v32 = vadd.f32 %v299_v21, %v296_v19 }
  0x5b   :  { %v137_v51 = vmul.f32 %v136_v46, %v132_v33  ;;  %v305_v33 = vadd.f32 %v304_v24, %v303_v23 }
  0x5c   :  { %v293_v61 = vadd.f32 %v292_v56, %v869_v41  ;;  %v310_v43 = vsub.f32 %v838_v20, %v300_v32 }
  0x5d   :  { %v138_v55 = vadd.f32 1.0, %v137_v51 }
  0x5e   :  { %v294_v63 = vmul.f32 %v293_v61, %v289_v45  ;;  %v312_v45 = vsub.f32 %v845_v25, %v305_v33 }
  0x5f   :  { %594 = vrcp.f32 %v138_v55 }
  0x60   :  { %v295_v8 = vadd.f32 1.0, %v294_v63 }
  0x62   :  { %596 = vrcp.f32 %v295_v8 }
  0x69   :  { %v595_v16 = vpop.eup %594 }
  0x6a   :  { %v150_v18 = vmul.f32 %v595_v16, %v138_v55 }
  0x6c   :  { %v151_v26 = vsub.f32 2.0, %v150_v18  ;;  %v597_v35 = vpop.eup %596 }
  0x6d   :  { %v307_v38 = vmul.f32 %v597_v35, %v295_v8 }
  0x6e   :  { %v152_v30 = vmul.f32 %v595_v16, %v151_v26 }
  0x6f   :  { %v308_v42 = vsub.f32 2.0, %v307_v38 }
  0x70   :  { %v154_v36 = vmul.f32 %v153_v27, %v152_v30  ;;  %v156_v37 = vmul.f32 %v155_v29, %v152_v30 }
  0x71   :  { %v309_v47 = vmul.f32 %v597_v35, %v308_v42 }
  0x72   :  { %v157_v39 = vmul.f32 %v154_v36, %v154_v36  ;;  %v158_v40 = vmul.f32 %v156_v37, %v156_v37  ;;  %v159_v7 = vmul.f32 %v156_v37, %v154_v36 }
  0x73   :  { %v311_v52 = vmul.f32 %v310_v43, %v309_v47  ;;  %v313_v53 = vmul.f32 %v312_v45, %v309_v47 }
  0x74   :  { %v160_v46 = vadd.f32 %v158_v40, %v157_v39  ;;  %v168_v0 = vmul.f32 2.0, %v157_v39  ;;  %v172_v1 = vmul.f32 2.0, %v158_v40  ;;  %v167_v14 = vmul.f32 %v159_v7, %v873_v44 }
  0x75   :  { %v314_v55 = vmul.f32 %v311_v52, %v311_v52  ;;  %v315_v56 = vmul.f32 %v313_v53, %v313_v53  ;;  %v175_v21 = vmul.f32 %v159_v7, %v882_v50  ;;  %v316_v24 = vmul.f32 %v313_v53, %v311_v52 }
  0x76   :  { %v161_v51 = vmul.f32 %v160_v46, %v836_v17  ;;  %v169_v8 = vadd.f32 %v168_v0, %v160_v46  ;;  %v173_v11 = vadd.f32 %v172_v1, %v160_v46 }
  0x77   :  { %v317_v58 = vadd.f32 %v315_v56, %v314_v55  ;;  %v325_v15 = vmul.f32 2.0, %v314_v55  ;;  %v329_v16 = vmul.f32 2.0, %v315_v56  ;;  %v324_v35 = vmul.f32 %v316_v24, %v898_v2 }
  0x78   :  { %v162_v54 = vadd.f32 %v161_v51, %v840_v22  ;;  %v170_v18 = vmul.f32 %v169_v8, %v877_v48  ;;  %v174_v19 = vmul.f32 %v173_v11, %v880_v49  ;;  %v332_v38 = vmul.f32 %v316_v24, %v900_v3 }
  0x79   :  { %v318_v61 = vmul.f32 %v317_v58, %v856_v31  ;;  %v326_v26 = vadd.f32 %v325_v15, %v317_v58  ;;  %v330_v27 = vadd.f32 %v329_v16, %v317_v58 }
  0x7a   :  { %v163_v57 = vmul.f32 %v162_v54, %v160_v46  ;;  %v171_v29 = vadd.f32 %v170_v18, %v167_v14  ;;  %v176_v30 = vadd.f32 %v175_v21, %v174_v19 }
  0x7b   :  { %v319_v4 = vadd.f32 %v318_v61, %v859_v34  ;;  %v327_v36 = vmul.f32 %v326_v26, %v896_v62  ;;  %v331_v37 = vmul.f32 %v330_v27, %v891_v59 }
  0x7c   :  { %v164_v60 = vadd.f32 %v163_v57, %v852_v28  ;;  %v181_v40 = vsub.f32 %v825_v9, %v171_v29  ;;  %v183_v42 = vsub.f32 %v827_v10, %v176_v30 }
  0x7d   :  { %v320_v6 = vmul.f32 %v319_v4, %v317_v58  ;;  %v328_v45 = vadd.f32 %v327_v36, %v324_v35 }
  0x7e   :  { %v165_v63 = vmul.f32 %v164_v60, %v160_v46  ;;  %v333_v46 = vadd.f32 %v332_v38, %v331_v37 }
  0x7f   :  { %v321_v12 = vadd.f32 %v320_v6, %v869_v41  ;;  %v338_v57 = vsub.f32 %v838_v20, %v328_v45 }
  0x80   :  { %v166_v5 = vadd.f32 1.0, %v165_v63 }
  0x81   :  { %v322_v13 = vmul.f32 %v321_v12, %v317_v58  ;;  %v340_v58 = vsub.f32 %v845_v25, %v333_v46 }
  0x82   :  { %598 = vrcp.f32 %v166_v5 }
  0x83   :  { %v323_v23 = vadd.f32 1.0, %v322_v13 }
  0x85   :  { %600 = vrcp.f32 %v323_v23 }
  0x8c   :  { %v599_v32 = vpop.eup %598 }
  0x8d   :  { %v178_v33 = vmul.f32 %v599_v32, %v166_v5 }
  0x8f   :  { %v179_v39 = vsub.f32 2.0, %v178_v33  ;;  %v601_v47 = vpop.eup %600 }
  0x90   :  { %v335_v53 = vmul.f32 %v601_v47, %v323_v23 }
  0x91   :  { %v180_v43 = vmul.f32 %v599_v32, %v179_v39 }
  0x92   :  { %v336_v56 = vsub.f32 2.0, %v335_v53 }
  0x93   :  { %v182_v51 = vmul.f32 %v181_v40, %v180_v43  ;;  %v184_v52 = vmul.f32 %v183_v42, %v180_v43 }
  0x94   :  { %v337_v61 = vmul.f32 %v601_v47, %v336_v56 }
  0x95   :  { %v185_v54 = vmul.f32 %v182_v51, %v182_v51  ;;  %v186_v55 = vmul.f32 %v184_v52, %v184_v52  ;;  %v187_v21 = vmul.f32 %v184_v52, %v182_v51 }
  0x96   :  { %v339_v0 = vmul.f32 %v338_v57, %v337_v61  ;;  %v341_v1 = vmul.f32 %v340_v58, %v337_v61 }
  0x97   :  { %v188_v60 = vadd.f32 %v186_v55, %v185_v54  ;;  %v196_v14 = vmul.f32 2.0, %v185_v54  ;;  %v200_v15 = vmul.f32 2.0, %v186_v55  ;;  %v195_v29 = vmul.f32 %v187_v21, %v873_v44 }
  0x98   :  { %v342_v5 = vmul.f32 %v339_v0, %v339_v0  ;;  %v343_v6 = vmul.f32 %v341_v1, %v341_v1  ;;  %v203_v36 = vmul.f32 %v187_v21, %v882_v50  ;;  %v344_v38 = vmul.f32 %v341_v1, %v339_v0 }
  0x99   :  { %v189_v63 = vmul.f32 %v188_v60, %v836_v17  ;;  %v197_v23 = vadd.f32 %v196_v14, %v188_v60  ;;  %v201_v24 = vadd.f32 %v200_v15, %v188_v60 }
  0x9a   :  { %v345_v8 = vadd.f32 %v343_v6, %v342_v5  ;;  %v353_v30 = vmul.f32 2.0, %v342_v5  ;;  %v357_v32 = vmul.f32 2.0, %v343_v6  ;;  %v352_v47 = vmul.f32 %v344_v38, %v898_v2 }
  0x9b   :  { %v190_v4 = vadd.f32 %v189_v63, %v840_v22  ;;  %v198_v33 = vmul.f32 %v197_v23, %v877_v48  ;;  %v202_v35 = vmul.f32 %v201_v24, %v880_v49  ;;  %v360_v53 = vmul.f32 %v344_v38, %v900_v3 }
  0x9c   :  { %v346_v12 = vmul.f32 %v345_v8, %v856_v31  ;;  %v354_v39 = vadd.f32 %v353_v30, %v345_v8  ;;  %v358_v40 = vadd.f32 %v357_v32, %v345_v8 }
  0x9d   :  { %v191_v7 = vmul.f32 %v190_v4, %v188_v60  ;;  %v199_v42 = vadd.f32 %v198_v33, %v195_v29  ;;  %v204_v43 = vadd.f32 %v203_v36, %v202_v35 }
  0x9e   :  { %v347_v16 = vadd.f32 %v346_v12, %v859_v34  ;;  %v355_v51 = vmul.f32 %v354_v39, %v896_v62  ;;  %v359_v52 = vmul.f32 %v358_v40, %v891_v59 }
  0x9f   :  { %v192_v11 = vadd.f32 %v191_v7, %v852_v28  ;;  %v209_v55 = vsub.f32 %v825_v9, %v199_v42  ;;  %v211_v56 = vsub.f32 %v827_v10, %v204_v43 }
  0xa0   :  { %v348_v19 = vmul.f32 %v347_v16, %v345_v8  ;;  %v356_v58 = vadd.f32 %v355_v51, %v352_v47 }
  0xa1   :  { %v193_v13 = vmul.f32 %v192_v11, %v188_v60  ;;  %v361_v60 = vadd.f32 %v360_v53, %v359_v52 }
  0xa2   :  { %v349_v26 = vadd.f32 %v348_v19, %v869_v41  ;;  %v366_v7 = vsub.f32 %v838_v20, %v356_v58 }
  0xa3   :  { %v194_v18 = vadd.f32 1.0, %v193_v13 }
  0xa4   :  { %v350_v27 = vmul.f32 %v349_v26, %v345_v8  ;;  %v368_v8 = vsub.f32 %v845_v25, %v361_v60 }
  0xa5   :  { %602 = vrcp.f32 %v194_v18 }
  0xa6   :  { %v351_v37 = vadd.f32 1.0, %v350_v27 }
  0xa8   :  { %604 = vrcp.f32 %v351_v37 }
  0xaf   :  { %v603_v45 = vpop.eup %602 }
  0xb0   :  { %v206_v46 = vmul.f32 %v603_v45, %v194_v18 }
  0xb2   :  { %v207_v54 = vsub.f32 2.0, %v206_v46  ;;  %v605_v61 = vpop.eup %604 }
  0xb3   :  { %v363_v1 = vmul.f32 %v605_v61, %v351_v37 }
  0xb4   :  { %v208_v57 = vmul.f32 %v603_v45, %v207_v54 }
  0xb5   :  { %v364_v6 = vsub.f32 2.0, %v363_v1  ;;  %v400_v1 = vstv %s980_s28 }
  0xb6   :  { %v210_v63 = vmul.f32 %v209_v55, %v208_v57  ;;  %v212_v0 = vmul.f32 %v211_v56, %v208_v57 }
  0xb7   :  { %v365_v12 = vmul.f32 %v605_v61, %v364_v6 }
  0xb8   :  { %v213_v4 = vmul.f32 %v210_v63, %v210_v63  ;;  %v214_v5 = vmul.f32 %v212_v0, %v212_v0  ;;  %v215_v38 = vmul.f32 %v212_v0, %v210_v63 }
  0xb9   :  { %v367_v14 = vmul.f32 %v366_v7, %v365_v12  ;;  %v369_v15 = vmul.f32 %v368_v8, %v365_v12 }
  0xba   :  { %v216_v11 = vadd.f32 %v214_v5, %v213_v4  ;;  %v224_v33 = vmul.f32 2.0, %v213_v4  ;;  %v231_v47 = vmul.f32 %v215_v38, %v882_v50  ;;  %v405_v4 = vstv %s982_s29 }
  0xbb   :  { %v370_v18 = vmul.f32 %v367_v14, %v367_v14  ;;  %v371_v19 = vmul.f32 %v369_v15, %v369_v15 }
  0xbc   :  { %v217_v13 = vmul.f32 %v216_v11, %v836_v17  ;;  %v228_v17 = vmul.f32 2.0, %v214_v5  ;;  %v225_v39 = vadd.f32 %v224_v33, %v216_v11  ;;  %v407_v5 = vstv %s984_s30 }
  0xbd   :  { %v373_v23 = vadd.f32 %v371_v19, %v370_v18  ;;  %v385_v37 = vmul.f32 2.0, %v371_v19 }
  0xbe   :  { %v218_v16 = vadd.f32 %v217_v13, %v840_v22  ;;  %v381_v22 = vmul.f32 2.0, %v370_v18  ;;  %v229_v40 = vadd.f32 %v228_v17, %v216_v11  ;;  %v226_v45 = vmul.f32 %v225_v39, %v877_v48 }
  0xbf   :  { %v374_v26 = vmul.f32 %v373_v23, %v856_v31  ;;  %v386_v43 = vadd.f32 %v385_v37, %v373_v23  ;;  %v410_v18 = vstv %s994_s12 }
  0xc0   :  { %v219_v21 = vmul.f32 %v218_v16, %v216_v11  ;;  %v382_v31 = vadd.f32 %v381_v22, %v373_v23  ;;  %v230_v46 = vmul.f32 %v229_v40, %v880_v49  ;;  %v403_v16 = vstv %s992_s11 }
  0xc1   :  { %v375_v29 = vadd.f32 %v374_v26, %v859_v34  ;;  %v223_v34 = vmul.f32 %v215_v38, %v873_v44  ;;  %v387_v54 = vmul.f32 %v386_v43, %v891_v59  ;;  %v417_v26 = vstv %s996_s13 }
  0xc2   :  { %v220_v24 = vadd.f32 %v219_v21, %v852_v28  ;;  %v372_v28 = vmul.f32 %v369_v15, %v367_v14  ;;  %v383_v53 = vmul.f32 %v382_v31, %v896_v62  ;;  %v232_v57 = vadd.f32 %v231_v47, %v230_v46 }
  0xc3   :  { %v376_v32 = vmul.f32 %v375_v29, %v373_v23  ;;  %v227_v56 = vadd.f32 %v226_v45, %v223_v34  ;;  %v435_v31 = vstv %s419_s16  ;;  %v437_v43 = vstv %s420_s17 }
  0xc4   :  { %v221_v27 = vmul.f32 %v220_v24, %v216_v11  ;;  %v380_v52 = vmul.f32 %v372_v28, %v898_v2  ;;  %v388_v55 = vmul.f32 %v372_v28, %v900_v3  ;;  %v239_v62 = vsub.f32 %v827_v10, %v232_v57 }
  0xc5   :  { %v377_v35 = vadd.f32 %v376_v32, %v869_v41  ;;  %v237_v59 = vsub.f32 %v825_v9, %v227_v56  ;;  %v398_v10 = vstv %s978_s27 }
  0xc6   :  { %v222_v30 = vadd.f32 1.0, %v221_v27  ;;  %v384_v44 = vadd.f32 %v383_v53, %v380_v52  ;;  %v389_v48 = vadd.f32 %v388_v55, %v387_v54  ;;  %v440_v52 = vstv %s421_s2 }
  0xc7   :  { %v378_v36 = vmul.f32 %v377_v35, %v373_v23 }
  0xc8   :  { %606 = vrcp.f32 %v222_v30  ;;  %v394_v60 = vsub.f32 %v838_v20, %v384_v44  ;;  %v396_v61 = vsub.f32 %v845_v25, %v389_v48  ;;  %v412_v20 = vstv %s986_s9 }
  0xc9   :  { %v379_v42 = vadd.f32 1.0, %v378_v36  ;;  %v414_v25 = vstv %s988_s10 }
  0xcb   :  { %608 = vrcp.f32 %v379_v42 }
  0xd2   :  { %v607_v41 = vpop.eup %606 }
  0xd3   :  { %v234_v51 = vmul.f32 %v607_v41, %v222_v30 }
  0xd5   :  { %v235_v58 = vsub.f32 2.0, %v234_v51  ;;  %v609_v49 = vpop.eup %608 }
  0xd6   :  { %v391_v2 = vmul.f32 %v609_v49, %v379_v42 }
  0xd7   :  { %v236_v50 = vmul.f32 %v607_v41, %v235_v58 }
  0xd8   :  { %v392_v3 = vsub.f32 2.0, %v391_v2 }
  0xd9   :  { %v1000_v63 = vmul.f32 %v237_v59, %v236_v50  ;;  %v1002_v9 = vmul.f32 %v239_v62, %v236_v50 }
  0xda   :  { %v393_v0 = vmul.f32 %v609_v49, %v392_v3 }
  0xdb   :  { %v422_v8 = vmul.f32 %v1000_v63, %v1000_v63  ;;  %v423_v11 = vmul.f32 %v1002_v9, %v1002_v9  ;;  %v436_v46 = vmul.f32 %v435_v31, %v1000_v63  ;;  %v438_v47 = vmul.f32 %v437_v43, %v1002_v9 }
  0xdc   :  { %v395_v6 = vmul.f32 %v394_v60, %v393_v0  ;;  %v397_v7 = vmul.f32 %v396_v61, %v393_v0 }
  0xdd   :  { %v424_v32 = vadd.f32 %v423_v11, %v422_v8  ;;  %v439_v54 = vadd.f32 %v438_v47, %v436_v46 }
  0xde   :  { %v399_v12 = vmul.f32 %v398_v10, %v395_v6  ;;  %v401_v13 = vmul.f32 %v400_v1, %v397_v7  ;;  %v406_v14 = vmul.f32 %v405_v4, %v395_v6  ;;  %v408_v15 = vmul.f32 %v407_v5, %v397_v7 }
  0xdf   :  { %v413_v19 = vmul.f32 %v412_v20, %v395_v6  ;;  %v415_v21 = vmul.f32 %v414_v25, %v397_v7  ;;  %v425_v38 = vadd.f32 1.0, %v424_v32  ;;  %v441_v57 = vadd.f32 %v440_v52, %v439_v54 }
  0xe0   :  { %v402_v23 = vadd.f32 %v401_v13, %v399_v12  ;;  %v409_v24 = vadd.f32 %v408_v15, %v406_v14  ;;  %v468_v1 = vstv %s1010_s1  ;;  %v465_v4 = vstv %s1004_s14 }
  0xe1   :  { %v416_v27 = vadd.f32 %v415_v21, %v413_v19  ;;  %v471_v5 = vstv %s1020_s15 }
  0xe2   :  { %v404_v29 = vadd.f32 %v403_v16, %v402_v23  ;;  %v411_v30 = vadd.f32 %v410_v18, %v409_v24 }
  0xe3   :  { %v418_v33 = vadd.f32 %v417_v26, %v416_v27 }
  0xe4   :  { %v426_v17 = vmul.f32 %v404_v29, %v1000_v63  ;;  %v427_v35 = vmul.f32 %v411_v30, %v1002_v9  ;;  %v430_v36 = vmul.f32 %v404_v29, %v404_v29  ;;  %v431_v22 = vmul.f32 %v411_v30, %v411_v30 }
  0xe5   :  { %v433_v37 = vmul.f32 %v418_v33, %v418_v33  ;;  %v442_v41 = vmul.f32 %v435_v31, %v404_v29  ;;  %v443_v51 = vmul.f32 %v437_v43, %v411_v30  ;;  %v445_v56 = vmul.f32 %v440_v52, %v418_v33 }
  0xe6   :  { %v428_v39 = vadd.f32 %v427_v35, %v426_v17  ;;  %v432_v40 = vadd.f32 %v431_v22, %v430_v36 }
  0xe7   :  { %v444_v55 = vadd.f32 %v443_v51, %v442_v41 }
  0xe8   :  { %v429_v42 = vadd.f32 %v428_v39, %v418_v33  ;;  %v434_v28 = vadd.f32 %v433_v37, %v432_v40 }
  0xe9   :  { %v446_v58 = vadd.f32 %v445_v56, %v444_v55 }
  0xea   :  { %v447_v34 = vmul.f32 %v434_v28, %v425_v38  ;;  %v448_v45 = vmul.f32 %v429_v42, %v429_v42  ;;  %v455_v48 = vmul.f32 %v441_v57, %v434_v28  ;;  %v459_v50 = vmul.f32 %v441_v57, %v429_v42 }
  0xeb   :  { %v454_v44 = vmul.f32 %v446_v58, %v429_v42  ;;  %v458_v49 = vmul.f32 %v446_v58, %v425_v38 }
  0xec   :  { %v449_v53 = vsub.f32 %v447_v34, %v448_v45 }
  0xed   :  { %v456_v3 = vsub.f32 %v454_v44, %v455_v48  ;;  %v460_v60 = vsub.f32 %v458_v49, %v459_v50 }
  0xee   :  { %610 = vrcp.f32 %v449_v53 }
  0xf8   :  { %v611_v59 = vpop.eup %610 }
  0xf9   :  { %v451_v62 = vmul.f32 %v611_v59, %v449_v53 }
  0xfb   :  { %v452_v2 = vsub.f32 2.0, %v451_v62 }
  0xfd   :  { %v453_v61 = vmul.f32 %v611_v59, %v452_v2 }
  0xff   :  { %v457_v0 = vmul.f32 %v456_v3, %v453_v61  ;;  %v461_v10 = vmul.f32 %v460_v60, %v453_v61 }
 0x101   :  { %v463_v6 = vmul.f32 %v457_v0, %v1002_v9  ;;  %v467_v7 = vmul.f32 %v461_v10, %v411_v30  ;;  %v462_v20 = vmul.f32 %v457_v0, %v1000_v63  ;;  %v464_v25 = vmul.f32 %v461_v10, %v404_v29 }
 0x102   :  { %v470_v8 = vmul.f32 %v461_v10, %v418_v33 }
 0x103   :  { %v469_v11 = vadd.f32 %v468_v1, %v467_v7  ;;  %v466_v12 = vadd.f32 %v465_v4, %v464_v25 }
 0x104   :  { %v472_v13 = vadd.f32 %v471_v5, %v470_v8 }
 0x105   :  { %v476_v14 = vadd.f32 %v469_v11, %v463_v6  ;;  %v483_v15 = vsub.f32 %v463_v6, %v469_v11  ;;  %v473_v16 = vadd.f32 %v466_v12, %v462_v20  ;;  %v482_v18 = vsub.f32 %v462_v20, %v466_v12 }
 0x106   :  { %v479_v19 = vadd.f32 %v472_v13, %v457_v0  ;;  %v484_v21 = vsub.f32 %v457_v0, %v472_v13 }
 0x107   :  { %v477_v9 = vmul.f32 0.5, %v476_v14  ;;  %v486_v23 = vmul.f32 %v483_v15, %v483_v15  ;;  %v474_v63 = vmul.f32 0.5, %v473_v16  ;;  %v485_v24 = vmul.f32 %v482_v18, %v482_v18 }
 0x108   :  { %v480_v26 = vmul.f32 0.5, %v479_v19  ;;  %v488_v27 = vmul.f32 %v484_v21, %v484_v21 }
 0x109   :  { %478 = vst [vmem:[#allocation8] sm:$0xf] %v477_v9  ;;  %475 = vst [vmem:[#allocation7] sm:$0xf] %v474_v63  ;;  %v487_v29 = vadd.f32 %v486_v23, %v485_v24 }
 0x10a   :  { %481 = vst [vmem:[#allocation10] sm:$0xf] %v480_v26 }
 0x10b   :  { %657 = shalt.err (!%p654_p1)
}
 0x10c   :  { %s658_s0 = scalar_lea.hbm %s1103_s6, 64 }
 0x10d   :  { %p659_p2 = scmp.ne.s32.totalorder %s1103_s6, %s658_s0  ;;  %p662_p3 = scmp.lt.u32.totalorder %s658_s0, %s1103_s6 }
 0x10f   :  { %p664_p4 = pnand %p662_p3, %p659_p2 }
 0x111   :  { %667 = shalt.err (!%p664_p4)
}
 0x112   :  { %517 = dma.vmem_to_hbm [thread:$0]  %s515_s19, 64, %s1103_s6, [#allocation9]   ;;  %v489_v30 = vadd.f32 %v488_v27, %v487_v29 }
 0x113   :  { %s668_s9 = scalar_lea.vmem %s1035_s4, 64  ;;  %p673_p6 = scmp.lt.s32.totalorder %s1035_s4, %s1035_s4 }
 0x114   :  { %p669_p5 = scmp.ne.s32.totalorder %s1035_s4, %s668_s9  ;;  %p674_p7 = scmp.lt.s32.totalorder %s668_s9, %s668_s9 }
 0x116   :  { %p675_p8 = por %p674_p7, %p673_p6 }
 0x118   :  { %p676_p9 = pnand %p675_p8, %p669_p5 }
 0x11a   :  { %679 = shalt.err (!%p676_p9)
}
 0x11b   :  { %s680_s12 = scalar_lea.hbm %s1102_s5, 64 }
 0x11c   :  { %p681_p10 = scmp.ne.s32.totalorder %s1102_s5, %s680_s12  ;;  %p684_p11 = scmp.lt.u32.totalorder %s680_s12, %s1102_s5 }
 0x11e   :  { %p686_p12 = pnand %p684_p11, %p681_p10 }
 0x120   :  { %689 = shalt.err (!%p686_p12)
}
 0x121   :  { %507 = dma.vmem_to_hbm [thread:$0]  %s1035_s4, 64, %s1102_s5, [#allocation4]  }
 0x122   :  { %s690_s17 = scalar_lea.vmem %s1037_s21, 64  ;;  %p695_p0 = scmp.lt.s32.totalorder %s1037_s21, %s1037_s21 }
 0x123   :  { %p691_p13 = scmp.ne.s32.totalorder %s1037_s21, %s690_s17  ;;  %p696_p1 = scmp.lt.s32.totalorder %s690_s17, %s690_s17 }
 0x125   :  { %p697_p2 = por %p696_p1, %p695_p0 }
 0x127   :  { %p698_p3 = pnand %p697_p2, %p691_p13 }
 0x129   :  { %701 = shalt.err (!%p698_p3)
}
 0x12a   :  { %s702_s19 = scalar_lea.hbm %s1104_s7, 64 }
 0x12b   :  { %p703_p4 = scmp.ne.s32.totalorder %s1104_s7, %s702_s19  ;;  %p706_p5 = scmp.lt.u32.totalorder %s702_s19, %s1104_s7 }
 0x12d   :  { %p708_p6 = pnand %p706_p5, %p703_p4 }
 0x12f   :  { %711 = shalt.err (!%p708_p6)
}
 0x130   :  { %527 = dma.vmem_to_hbm [thread:$0]  %s1037_s21, 64, %s1104_s7, [#allocation9]   ;;  %612 = vrsqrt.f32 %v489_v30  ;;  %vm492_vm0 = vcmp.eq.f32.partialorder %v489_v30, inf  ;;  %v495_v33 = vand.u32 2147483648, %v489_v30  ;;  %vm494_vm1 = vcmp.eq.f32.partialorder %v489_v30, 0.0 }
 0x131   :  { %s749_s24 = smov [#allocation11]  }
 0x132   :  { %s534_s0 = sshll.u32 %s749_s24, 4  ;;  %s535_s0 = int_to_ptr.vmem [resolvable:$true] %s534_s0 }
 0x133   :  { %s712_s25 = scalar_lea.vmem %s535_s0, 64  ;;  %p717_p8 = scmp.lt.s32.totalorder %s535_s0, %s535_s0 }
 0x134   :  { %p713_p7 = scmp.ne.s32.totalorder %s535_s0, %s712_s25  ;;  %p718_p9 = scmp.lt.s32.totalorder %s712_s25, %s712_s25 }
 0x136   :  { %p719_p10 = por %p718_p9, %p717_p8 }
 0x138   :  { %p720_p11 = pnand %p719_p10, %p713_p7 }
 0x13a   :  { %v613_v32 = vpop.eup %612 }
 0x13b   :  { %v491_v17 = vmul.f32 %v613_v32, %v489_v30 }
 0x13d   :  { %v493_v35 = vsel %vm492_vm0, %v489_v30, %v491_v17 }
 0x13e   :  { %v496_v36 = vsel %vm494_vm1, %v495_v33, %v493_v35 }
 0x13f   :  { %497 = vst [vmem:[#allocation11] sm:$0xf] %v496_v36 }
 0x140   :  { %723 = shalt.err (!%p720_p11)
}
 0x141   :  { %s724_s26 = scalar_lea.hbm %s1105_s8, 64 }
 0x142   :  { %p725_p12 = scmp.ne.s32.totalorder %s1105_s8, %s724_s26  ;;  %p728_p13 = scmp.lt.u32.totalorder %s724_s26, %s1105_s8 }
 0x144   :  { %p730_p0 = pnand %p728_p13, %p725_p12 }
 0x146   :  { %733 = shalt.err (!%p730_p0)
}
 0x147   :  { %537 = dma.vmem_to_hbm [thread:$0]  %s535_s0, 64, %s1105_s8, [#allocation12]  }
 0x148   :  { %738 = dma.done.wait [#allocation4], 64  }
 0x149   :  { %739 = vsyncadd [#allocation4], 4294967232 }
 0x14a   :  { %740 = dma.done.wait [#allocation9], 128  }
 0x14b   :  { %741 = vsyncadd [#allocation9], 4294967168 }
 0x14c   :  { %742 = dma.done.wait [#allocation12], 64  }
 0x14d   :  { %743 = vsyncadd [#allocation12], 4294967232 }
 0x14e   :  { %550 = vsyncpa [#allocation3], 1 }
 0x14f   :  { %551 = vsyncpa [#allocation4], 1 }
 0x150   :  { %552 = vsyncpa [#allocation9], 1 }
 0x151   :  { %553 = vsyncpa [#allocation12], 1 }
 0x152   :  { %554 = vsyncpa [#allocation5], 1 }

</bundles_post_ra>
